<compile_context>
chip_gen: v5e
topology: v5e:2x2
jax: 0.10.0
libtpu: 0.0.40
codegen_flags: <defaults>
</compile_context>

<pallas_src>
import functools

import jax
import jax.numpy as jnp
from jax import lax
from jax.experimental import pallas as pl
from jax.experimental.pallas import tpu as pltpu


def basic_block_kernel(xp_ref, w1_ref, b1_ref, w2_ref, b2_ref, out_ref, *,
                       tile_h, height, width):
    """One (batch, H-tile) step of the fused BasicBlock2D forward.

    xp_ref : (Cin, H+4, W+2)   spatially padded input slice (pad 2 in H, 1 in W)
    w1_ref : (Ch,  9*Cin)      conv1 weight, BN1 scale folded, tap-major columns
    b1_ref : (Ch,  1)          BN1 shift
    w2_ref : (Cout, 9*Ch)      conv2 weight, BN2 scale folded
    b2_ref : (Cout, 1)         BN2 shift
    out_ref: (Cout, tile_h*W)  lane-dense output tile (NCHW with H,W flattened)
    """
    W = width
    t = pl.program_id(1)
    Cin = xp_ref.shape[0]
    Ch = w1_ref.shape[0]
    R1 = tile_h + 2                              # intermediate rows incl. halo

    # Halo'd input window for this H-tile: rows [t*tile_h, t*tile_h + tile_h+4)
    # of the padded input (padded row = global row + 2).
    h0 = pl.multiple_of(t * tile_h, tile_h)
    xs = xp_ref[:, pl.ds(h0, tile_h + 4), :].astype(jnp.float32)  # (Cin, tile_h+4, W+2)

    # ---- conv1 + BN1 + ReLU: single im2col matmul (transposed so the large
    #      spatial axis sits on the MXU column / lane dimension) -------------
    slabs = []
    for kh in range(3):
        for kw in range(3):
            slabs.append(xs[:, kh:kh + R1, kw:kw + W].reshape(Cin, R1 * W))
    p1 = jnp.concatenate(slabs, axis=0)                       # (9*Cin, R1*W)
    out1 = jnp.dot(w1_ref[...], p1, preferred_element_type=jnp.float32)
    out1 = jnp.maximum(out1 + b1_ref[...], 0.0).reshape(Ch, R1, W)

    # conv2 zero-padding in H: halo rows of out1 that fall outside the image
    # must be zero (they belong to conv2's padding, not to conv1's output).
    r_global = lax.broadcasted_iota(jnp.int32, (Ch, R1, W), 1) + (t * tile_h - 1)
    out1 = jnp.where((r_global >= 0) & (r_global < height), out1, 0.0)

    # conv2 zero-padding in W: two zero columns on the small per-tile tensor
    # (replaces the old full-tensor dynamic_update_slice).
    zcol = jnp.zeros((Ch, R1, 1), jnp.float32)
    out1p = jnp.concatenate([zcol, out1, zcol], axis=2)       # (Ch, R1, W+2)

    # ---- conv2 + BN2: single im2col matmul ---------------------------------
    slabs2 = []
    for kh in range(3):
        for kw in range(3):
            slabs2.append(out1p[:, kh:kh + tile_h, kw:kw + W].reshape(Ch, tile_h * W))
    p2 = jnp.concatenate(slabs2, axis=0)                      # (9*Ch, tile_h*W)
    out2 = jnp.dot(w2_ref[...], p2, preferred_element_type=jnp.float32) + b2_ref[...]

    # ---- identity residual (recovered from the same input window) + ReLU ---
    res = xs[:, 2:2 + tile_h, 1:1 + W].reshape(Cin, tile_h * W)
    out_ref[...] = jnp.maximum(out2 + res, 0.0).astype(out_ref.dtype)


def fold_bn(w_hwio, gamma, beta, mean, var, eps=1e-5):
    """Fold eval-mode BatchNorm into a conv weight (HWIO) + per-channel shift."""
    scale = gamma / jnp.sqrt(var + eps)                 # (Cout,)
    w_f = w_hwio * scale[None, None, None, :]
    b_f = beta - mean * scale
    return w_f, b_f


def basic_block_forward(x_nchw, params, tile_h=8):
    """NCHW in/out wrapper, identity residual (stride=1, Cin == Cout)."""
    w1, b1, w2, b2 = params                             # HWIO weights, BN folded
    N, Cin, H, W = x_nchw.shape
    Ch = w1.shape[-1]
    Cout = w2.shape[-1]
    assert Cin == Cout, "identity residual requires in_channels == out_channels"
    if H % tile_h != 0:
        tile_h = H
    num_t = H // tile_h

    # Spatial zero-pad once: 2 rows (halo for the two stacked 3x3 convs), 1 col.
    xp = jnp.pad(x_nchw, ((0, 0), (0, 0), (2, 2), (1, 1))).astype(jnp.float32)

    # Tap-major 2-D weights so each conv is one (Cout, 9*Cin) x (9*Cin, M) matmul.
    w1t = jnp.transpose(w1, (3, 0, 1, 2)).reshape(Ch, 9 * Cin).astype(jnp.float32)
    w2t = jnp.transpose(w2, (3, 0, 1, 2)).reshape(Cout, 9 * Ch).astype(jnp.float32)
    b1c = b1.reshape(Ch, 1).astype(jnp.float32)
    b2c = b2.reshape(Cout, 1).astype(jnp.float32)

    kernel = functools.partial(basic_block_kernel,
                               tile_h=tile_h, height=H, width=W)

    flops = 2 * N * H * W * 9 * (Cin * Ch + Ch * Cout)
    bytes_accessed = 4 * (xp.size + w1t.size + w2t.size + b1c.size + b2c.size
                          + N * Cout * H * W)

    out = pl.pallas_call(
        kernel,
        out_shape=jax.ShapeDtypeStruct((N, Cout, H * W), jnp.float32),
        grid=(N, num_t),
        in_specs=[
            pl.BlockSpec((None, Cin, H + 4, W + 2), lambda n, t: (n, 0, 0, 0)),
            pl.BlockSpec((Ch, 9 * Cin), lambda n, t: (0, 0)),
            pl.BlockSpec((Ch, 1), lambda n, t: (0, 0)),
            pl.BlockSpec((Cout, 9 * Ch), lambda n, t: (0, 0)),
            pl.BlockSpec((Cout, 1), lambda n, t: (0, 0)),
        ],
        out_specs=pl.BlockSpec((None, Cout, tile_h * W), lambda n, t: (n, 0, t)),
        compiler_params=pltpu.CompilerParams(
            dimension_semantics=("parallel", "parallel"),
            vmem_limit_bytes=32 * 1024 * 1024),
        cost_estimate=pl.CostEstimate(flops=flops, transcendentals=0,
                                      bytes_accessed=bytes_accessed),
    )(xp, w1t, b1c, w2t, b2c)
    return out.reshape(N, Cout, H, W)


def reference_forward(x_nchw, params):
    """Plain-JAX reference for correctness checking (NCHW)."""
    w1, b1, w2, b2 = params
    dn = ('NCHW', 'HWIO', 'NCHW')
    o = lax.conv_general_dilated(x_nchw, w1, (1, 1), 'SAME', dimension_numbers=dn)
    o = jnp.maximum(o + b1[None, :, None, None], 0.0)
    o = lax.conv_general_dilated(o, w2, (1, 1), 'SAME', dimension_numbers=dn)
    o = o + b2[None, :, None, None]
    return jnp.maximum(o + x_nchw, 0.0)


if __name__ == "__main__":
    # BasicBlock2D(in_channels=4, hidden_channels=4, stride=1, act_type='relu',
    #              expansion=1)  -> no downsample, identity residual.
    N, Cin, H, W = 2, 4, 16, 16
    Ch = 4                    # hidden_channels
    Cout = Ch * 1             # expansion = 1

    key = jax.random.PRNGKey(0)
    keys = jax.random.split(key, 11)

    x = jax.random.normal(keys[0], (N, Cin, H, W), jnp.float32)

    # conv weights (HWIO), deterministic init
    w1_raw = jax.random.normal(keys[1], (3, 3, Cin, Ch), jnp.float32) * 0.1
    w2_raw = jax.random.normal(keys[2], (3, 3, Ch, Cout), jnp.float32) * 0.1

    # BatchNorm parameters (eval-mode running stats)
    g1 = 1.0 + 0.1 * jax.random.normal(keys[3], (Ch,), jnp.float32)
    be1 = 0.1 * jax.random.normal(keys[4], (Ch,), jnp.float32)
    m1 = 0.1 * jax.random.normal(keys[5], (Ch,), jnp.float32)
    v1 = jnp.abs(jax.random.normal(keys[6], (Ch,), jnp.float32)) + 0.5
    g2 = 1.0 + 0.1 * jax.random.normal(keys[7], (Cout,), jnp.float32)
    be2 = 0.1 * jax.random.normal(keys[8], (Cout,), jnp.float32)
    m2 = 0.1 * jax.random.normal(keys[9], (Cout,), jnp.float32)
    v2 = jnp.abs(jax.random.normal(keys[10], (Cout,), jnp.float32)) + 0.5

    w1, b1 = fold_bn(w1_raw, g1, be1, m1, v1)
    w2, b2 = fold_bn(w2_raw, g2, be2, m2, v2)
    params = (w1, b1, w2, b2)

    out = jax.block_until_ready(basic_block_forward(x, params))
    ref = jax.block_until_ready(reference_forward(x, params))

    assert out.shape == (N, Cout, H, W)
    assert jnp.max(jnp.abs(out - ref)) < 2e-4, "mismatch vs. reference"

    print("KERNEL_OK")
</pallas_src>

<mosaic_0001>
module attributes {stable_mosaic.version = 11 : i64} {
  func.func @basic_block_kernel(%arg0: i32, %arg1: i32, %arg2: memref<1x4x20x18xf32, #tpu.memory_space<vmem>>, %arg3: memref<4x36xf32, #tpu.memory_space<vmem>>, %arg4: memref<4x1xf32, #tpu.memory_space<vmem>>, %arg5: memref<4x36xf32, #tpu.memory_space<vmem>>, %arg6: memref<4x1xf32, #tpu.memory_space<vmem>>, %arg7: memref<1x4x128xf32, #tpu.memory_space<vmem>>) attributes {dimension_semantics = [#tpu.dimension_semantics<parallel>, #tpu.dimension_semantics<parallel>], iteration_bounds = array<i64: 2, 2>, scalar_prefetch = 0 : i64, scratch_operands = 0 : i64, tpu.core_type = #tpu.core_type<tc>, window_params = [{transform_indices = @transform_0, window_bounds = array<i64: 1, 4, 20, 18>}, {pipeline_mode = #tpu.pipeline_mode<synchronous>, transform_indices = @transform_1, window_bounds = array<i64: 4, 36>}, {pipeline_mode = #tpu.pipeline_mode<synchronous>, transform_indices = @transform_2, window_bounds = array<i64: 4, 1>}, {pipeline_mode = #tpu.pipeline_mode<synchronous>, transform_indices = @transform_3, window_bounds = array<i64: 4, 36>}, {pipeline_mode = #tpu.pipeline_mode<synchronous>, transform_indices = @transform_4, window_bounds = array<i64: 4, 1>}, {transform_indices = @transform_5, window_bounds = array<i64: 1, 4, 128>}]} {
    %c8_i32 = arith.constant 8 : i32
    %0 = arith.muli %arg1, %c8_i32 : i32
    %1 = tpu.assume_multiple %0, 8 : i32
    %c0 = arith.constant 0 : index
    %c0_0 = arith.constant 0 : index
    %2 = arith.index_cast %1 : i32 to index
    %c0_1 = arith.constant 0 : index
    %3 = vector.load %arg2[%c0, %c0_0, %2, %c0_1] : memref<1x4x20x18xf32, #tpu.memory_space<vmem>>, vector<1x4x12x18xf32>
    %4 = vector.shape_cast %3 : vector<1x4x12x18xf32> to vector<4x12x18xf32>
    %5 = vector.extract_strided_slice %4 {offsets = [0, 0, 0], sizes = [4, 10, 16], strides = [1, 1, 1]} : vector<4x12x18xf32> to vector<4x10x16xf32>
    %6 = vector.shape_cast %5 : vector<4x10x16xf32> to vector<4x160xf32>
    %7 = vector.extract_strided_slice %4 {offsets = [0, 0, 1], sizes = [4, 10, 16], strides = [1, 1, 1]} : vector<4x12x18xf32> to vector<4x10x16xf32>
    %8 = vector.shape_cast %7 : vector<4x10x16xf32> to vector<4x160xf32>
    %9 = vector.extract_strided_slice %4 {offsets = [0, 0, 2], sizes = [4, 10, 16], strides = [1, 1, 1]} : vector<4x12x18xf32> to vector<4x10x16xf32>
    %10 = vector.shape_cast %9 : vector<4x10x16xf32> to vector<4x160xf32>
    %11 = vector.extract_strided_slice %4 {offsets = [0, 1, 0], sizes = [4, 10, 16], strides = [1, 1, 1]} : vector<4x12x18xf32> to vector<4x10x16xf32>
    %12 = vector.shape_cast %11 : vector<4x10x16xf32> to vector<4x160xf32>
    %13 = vector.extract_strided_slice %4 {offsets = [0, 1, 1], sizes = [4, 10, 16], strides = [1, 1, 1]} : vector<4x12x18xf32> to vector<4x10x16xf32>
    %14 = vector.shape_cast %13 : vector<4x10x16xf32> to vector<4x160xf32>
    %15 = vector.extract_strided_slice %4 {offsets = [0, 1, 2], sizes = [4, 10, 16], strides = [1, 1, 1]} : vector<4x12x18xf32> to vector<4x10x16xf32>
    %16 = vector.shape_cast %15 : vector<4x10x16xf32> to vector<4x160xf32>
    %17 = vector.extract_strided_slice %4 {offsets = [0, 2, 0], sizes = [4, 10, 16], strides = [1, 1, 1]} : vector<4x12x18xf32> to vector<4x10x16xf32>
    %18 = vector.shape_cast %17 : vector<4x10x16xf32> to vector<4x160xf32>
    %19 = vector.extract_strided_slice %4 {offsets = [0, 2, 1], sizes = [4, 10, 16], strides = [1, 1, 1]} : vector<4x12x18xf32> to vector<4x10x16xf32>
    %20 = vector.shape_cast %19 : vector<4x10x16xf32> to vector<4x160xf32>
    %21 = vector.extract_strided_slice %4 {offsets = [0, 2, 2], sizes = [4, 10, 16], strides = [1, 1, 1]} : vector<4x12x18xf32> to vector<4x10x16xf32>
    %22 = vector.shape_cast %21 : vector<4x10x16xf32> to vector<4x160xf32>
    %23 = tpu.concatenate %6, %8, %10, %12, %14, %16, %18, %20, %22 in 0 : vector<4x160xf32>, vector<4x160xf32>, vector<4x160xf32>, vector<4x160xf32>, vector<4x160xf32>, vector<4x160xf32>, vector<4x160xf32>, vector<4x160xf32>, vector<4x160xf32> -> vector<36x160xf32>
    %c0_2 = arith.constant 0 : index
    %c0_3 = arith.constant 0 : index
    %24 = vector.load %arg3[%c0_2, %c0_3] : memref<4x36xf32, #tpu.memory_space<vmem>>, vector<4x36xf32>
    %cst = arith.constant dense<0.000000e+00> : vector<4x160xf32>
    %25 = tpu.matmul %24, %23, %cst {dimension_numbers = #tpu.dot_dimension_numbers<[1], [0], [0], [1], [0, 0, 1, 1], [], []>} : vector<4x36xf32>, vector<36x160xf32>, vector<4x160xf32> -> vector<4x160xf32>
    %c0_4 = arith.constant 0 : index
    %c0_5 = arith.constant 0 : index
    %26 = vector.load %arg4[%c0_4, %c0_5] : memref<4x1xf32, #tpu.memory_space<vmem>>, vector<4x1xf32>
    %27 = vector.broadcast %26 : vector<4x1xf32> to vector<4x160xf32>
    %28 = arith.addf %25, %27 : vector<4x160xf32>
    %cst_6 = arith.constant 0.000000e+00 : f32
    %29 = vector.broadcast %cst_6 : f32 to vector<4x160xf32>
    %30 = arith.maximumf %28, %29 : vector<4x160xf32>
    %31 = vector.shape_cast %30 : vector<4x160xf32> to vector<4x10x16xf32>
    %32 = tpu.iota {dimensions = array<i32: 1>} : vector<4x10x16xi32>
    %c8_i32_7 = arith.constant 8 : i32
    %33 = arith.muli %arg1, %c8_i32_7 : i32
    %c1_i32 = arith.constant 1 : i32
    %34 = arith.subi %33, %c1_i32 : i32
    %35 = vector.broadcast %34 : i32 to vector<4x10x16xi32>
    %36 = arith.addi %32, %35 : vector<4x10x16xi32>
    %c0_i32 = arith.constant 0 : i32
    %37 = vector.broadcast %c0_i32 : i32 to vector<4x10x16xi32>
    %38 = arith.cmpi sge, %36, %37 : vector<4x10x16xi32>
    %c16_i32 = arith.constant 16 : i32
    %39 = vector.broadcast %c16_i32 : i32 to vector<4x10x16xi32>
    %40 = arith.cmpi slt, %36, %39 : vector<4x10x16xi32>
    %41 = arith.andi %38, %40 : vector<4x10x16xi1>
    %cst_8 = arith.constant 0.000000e+00 : f32
    %42 = vector.broadcast %cst_8 : f32 to vector<4x10x16xf32>
    %43 = arith.select %41, %31, %42 : vector<4x10x16xi1>, vector<4x10x16xf32>
    %cst_9 = arith.constant 0.000000e+00 : f32
    %44 = vector.broadcast %cst_9 : f32 to vector<4x10x1xf32>
    %45 = tpu.concatenate %44, %43, %44 in 2 : vector<4x10x1xf32>, vector<4x10x16xf32>, vector<4x10x1xf32> -> vector<4x10x18xf32>
    %46 = vector.extract_strided_slice %45 {offsets = [0, 0, 0], sizes = [4, 8, 16], strides = [1, 1, 1]} : vector<4x10x18xf32> to vector<4x8x16xf32>
    %47 = vector.shape_cast %46 : vector<4x8x16xf32> to vector<4x128xf32>
    %48 = vector.extract_strided_slice %45 {offsets = [0, 0, 1], sizes = [4, 8, 16], strides = [1, 1, 1]} : vector<4x10x18xf32> to vector<4x8x16xf32>
    %49 = vector.shape_cast %48 : vector<4x8x16xf32> to vector<4x128xf32>
    %50 = vector.extract_strided_slice %45 {offsets = [0, 0, 2], sizes = [4, 8, 16], strides = [1, 1, 1]} : vector<4x10x18xf32> to vector<4x8x16xf32>
    %51 = vector.shape_cast %50 : vector<4x8x16xf32> to vector<4x128xf32>
    %52 = vector.extract_strided_slice %45 {offsets = [0, 1, 0], sizes = [4, 8, 16], strides = [1, 1, 1]} : vector<4x10x18xf32> to vector<4x8x16xf32>
    %53 = vector.shape_cast %52 : vector<4x8x16xf32> to vector<4x128xf32>
    %54 = vector.extract_strided_slice %45 {offsets = [0, 1, 1], sizes = [4, 8, 16], strides = [1, 1, 1]} : vector<4x10x18xf32> to vector<4x8x16xf32>
    %55 = vector.shape_cast %54 : vector<4x8x16xf32> to vector<4x128xf32>
    %56 = vector.extract_strided_slice %45 {offsets = [0, 1, 2], sizes = [4, 8, 16], strides = [1, 1, 1]} : vector<4x10x18xf32> to vector<4x8x16xf32>
    %57 = vector.shape_cast %56 : vector<4x8x16xf32> to vector<4x128xf32>
    %58 = vector.extract_strided_slice %45 {offsets = [0, 2, 0], sizes = [4, 8, 16], strides = [1, 1, 1]} : vector<4x10x18xf32> to vector<4x8x16xf32>
    %59 = vector.shape_cast %58 : vector<4x8x16xf32> to vector<4x128xf32>
    %60 = vector.extract_strided_slice %45 {offsets = [0, 2, 1], sizes = [4, 8, 16], strides = [1, 1, 1]} : vector<4x10x18xf32> to vector<4x8x16xf32>
    %61 = vector.shape_cast %60 : vector<4x8x16xf32> to vector<4x128xf32>
    %62 = vector.extract_strided_slice %45 {offsets = [0, 2, 2], sizes = [4, 8, 16], strides = [1, 1, 1]} : vector<4x10x18xf32> to vector<4x8x16xf32>
    %63 = vector.shape_cast %62 : vector<4x8x16xf32> to vector<4x128xf32>
    %64 = tpu.concatenate %47, %49, %51, %53, %55, %57, %59, %61, %63 in 0 : vector<4x128xf32>, vector<4x128xf32>, vector<4x128xf32>, vector<4x128xf32>, vector<4x128xf32>, vector<4x128xf32>, vector<4x128xf32>, vector<4x128xf32>, vector<4x128xf32> -> vector<36x128xf32>
    %c0_10 = arith.constant 0 : index
    %c0_11 = arith.constant 0 : index
    %65 = vector.load %arg5[%c0_10, %c0_11] : memref<4x36xf32, #tpu.memory_space<vmem>>, vector<4x36xf32>
    %cst_12 = arith.constant dense<0.000000e+00> : vector<4x128xf32>
    %66 = tpu.matmul %65, %64, %cst_12 {dimension_numbers = #tpu.dot_dimension_numbers<[1], [0], [0], [1], [0, 0, 1, 1], [], []>} : vector<4x36xf32>, vector<36x128xf32>, vector<4x128xf32> -> vector<4x128xf32>
    %c0_13 = arith.constant 0 : index
    %c0_14 = arith.constant 0 : index
    %67 = vector.load %arg6[%c0_13, %c0_14] : memref<4x1xf32, #tpu.memory_space<vmem>>, vector<4x1xf32>
    %68 = vector.broadcast %67 : vector<4x1xf32> to vector<4x128xf32>
    %69 = arith.addf %66, %68 : vector<4x128xf32>
    %70 = vector.extract_strided_slice %4 {offsets = [0, 2, 1], sizes = [4, 8, 16], strides = [1, 1, 1]} : vector<4x12x18xf32> to vector<4x8x16xf32>
    %71 = vector.shape_cast %70 : vector<4x8x16xf32> to vector<4x128xf32>
    %72 = arith.addf %69, %71 : vector<4x128xf32>
    %cst_15 = arith.constant 0.000000e+00 : f32
    %73 = vector.broadcast %cst_15 : f32 to vector<4x128xf32>
    %74 = arith.maximumf %72, %73 : vector<4x128xf32>
    %c0_16 = arith.constant 0 : index
    %c0_17 = arith.constant 0 : index
    %c0_18 = arith.constant 0 : index
    %75 = vector.load %arg7[%c0_16, %c0_17, %c0_18] : memref<1x4x128xf32, #tpu.memory_space<vmem>>, vector<1x4x128xf32>
    %76 = vector.shape_cast %75 : vector<1x4x128xf32> to vector<4x128xf32>
    %77 = vector.shape_cast %74 : vector<4x128xf32> to vector<1x4x128xf32>
    tpu.vector_store %arg7[%c0_16, %c0_17, %c0_18], %77 {strides = array<i32>} : memref<1x4x128xf32, #tpu.memory_space<vmem>>, vector<1x4x128xf32>,
    return
  }
  func.func @transform_0(%arg0: i32, %arg1: i32) -> (i32, i32, i32, i32) {
    %c0_i32 = arith.constant 0 : i32
    %c0_i32_0 = arith.constant 0 : i32
    %c0_i32_1 = arith.constant 0 : i32
    %c0_i32_2 = arith.constant 0 : i32
    return %arg0, %c0_i32, %c0_i32_0, %c0_i32_1 : i32, i32, i32, i32
  }
  func.func @transform_1(%arg0: i32, %arg1: i32) -> (i32, i32) {
    %c0_i32 = arith.constant 0 : i32
    %c0_i32_0 = arith.constant 0 : i32
    %c0_i32_1 = arith.constant 0 : i32
    return %c0_i32, %c0_i32_0 : i32, i32
  }
  func.func @transform_2(%arg0: i32, %arg1: i32) -> (i32, i32) {
    %c0_i32 = arith.constant 0 : i32
    %c0_i32_0 = arith.constant 0 : i32
    %c0_i32_1 = arith.constant 0 : i32
    return %c0_i32, %c0_i32_0 : i32, i32
  }
  func.func @transform_3(%arg0: i32, %arg1: i32) -> (i32, i32) {
    %c0_i32 = arith.constant 0 : i32
    %c0_i32_0 = arith.constant 0 : i32
    %c0_i32_1 = arith.constant 0 : i32
    return %c0_i32, %c0_i32_0 : i32, i32
  }
  func.func @transform_4(%arg0: i32, %arg1: i32) -> (i32, i32) {
    %c0_i32 = arith.constant 0 : i32
    %c0_i32_0 = arith.constant 0 : i32
    %c0_i32_1 = arith.constant 0 : i32
    return %c0_i32, %c0_i32_0 : i32, i32
  }
  func.func @transform_5(%arg0: i32, %arg1: i32) -> (i32, i32, i32) {
    %c0_i32 = arith.constant 0 : i32
    %c0_i32_0 = arith.constant 0 : i32
    return %arg0, %c0_i32, %arg1 : i32, i32, i32
  }
}

</mosaic_0001>

<bundles_post_ra>
// kernel: tpu_custom_call.1
= control target key start
LH: loop header
LB: loop body
LE: loop exit
PB: predicated region body
PF: predicated region fallthrough
CT: control target
= control target key end

     0   :  { %10 = vsyncpa [#allocation3], 0  ;;  %s5205_s0 = inlined_call_operand.vmem [shape: f32[2,4,20,18], index: 0, kind: input, shape index: {}]   ;;  %s5206_s1 = inlined_call_operand.vmem [shape: f32[4,36], index: 1, kind: input, shape index: {}]   ;;  %s5207_s2 = inlined_call_operand.vmem [shape: f32[4,1], index: 2, kind: input, shape index: {}]   ;;  %s5208_s3 = inlined_call_operand.vmem [shape: f32[4,36], index: 3, kind: input, shape index: {}]   ;;  %s5209_s4 = inlined_call_operand.vmem [shape: f32[4,1], index: 4, kind: input, shape index: {}]   ;;  %s5210_s5 = inlined_call_operand.hbm [shape: f32[2,4,256], index: 5, kind: output, shape index: {}]  }
   0x1   :  { %12 = vsyncpa [#allocation3 + $0x1], 0  ;;  %s3423_s18 = smov 0   ;;  %s3425_s19 = smov 0  }
   0x2   :  { %s3427_s20 = smov 0   ;;  %s3429_s21 = smov 0  }
   0x3   :  { %s3431_s22 = smov 0   ;;  %s3433_s23 = smov 0  }
   0x4   :  { %s3435_s24 = smov 0   ;;  %s3437_s25 = smov 0  }
   0x5 LB: > { %s2837_s26 = sadd.s32 4294967295, %s3378_s25   ;;  %s2838_s27 = sadd.s32 4294967294, %s3378_s25   ;;  %s3378_s25 = sphi %s3437_s25, %s18_s25   ;;  %s3374_s24 = sphi %s3435_s24, %s5261_s24   ;;  %s3370_s23 = sphi %s3433_s23, %s5260_s23   ;;  %s3366_s22 = sphi %s3431_s22, %s5259_s22   ;;  %s3362_s21 = sphi %s3429_s21, %s5258_s21   ;;  %s3358_s20 = sphi %s3427_s20, %s5257_s20   ;;  %s3354_s19 = sphi %s3425_s19, %s5256_s19   ;;  %s3350_s18 = sphi %s3423_s18, %s5255_s18  }
   0x6   : > { %s27_s28 = sadd.s32 1, %s3370_s23  ;;  %s30_s29 = sadd.s32 1, %s3374_s24 }
   0x7   : > { %p28_p0 = scmp.ge.s32.totalorder %s27_s28, 2  ;;  %p159_p1 = scmp.ne.s32.totalorder %s3358_s20, %s3354_s19 }
   0x8   : > { %p160_p2 = scmp.eq.s32.totalorder %s2837_s26, 3  ;;  %p165_p5 = scmp.ne.s32.totalorder %s3354_s19, %s3350_s18 }
   0x9   : > { %s5263_s28 = smov (%p28_p0, %s27_s28), 0  ;;  %s5265_s29 = smov (!%p28_p0, %s30_s29), %s3374_s24 }
   0xa   : > { %s145_s30 = ssub.s32 %s3370_s23, %s5263_s28  ;;  %p3474_p3 = por %p160_p2, %p159_p1 }
   0xb   : > { %p32_p4 = scmp.ge.s32.totalorder %s5265_s29, 2  ;;  %p166_p6 = scmp.eq.s32.totalorder %s2838_s27, 3 }
   0xc   : > { %p2841_p7 = scmp.ge.s32.totalorder %s3378_s25, 1  ;;  %p204_p9 = scmp.lt.s32.totalorder %s3378_s25, 5 }
   0xd   : > { %s5267_s29 = smov (%p32_p4, %s5265_s29), 0  ;;  %p3483_p8 = por %p166_p6, %p165_p5 }
   0xe   : > { %s144_s8 = ssub.s32 %s3374_s24, %s5267_s29  ;;  %s149_s9 = sadd.s32 1, %s3358_s20 }
   0xf   : > { %s146_s10 = sor.u32 %s145_s30, %s144_s8  ;;  %p205_p10 = pnand %p2841_p7, %p204_p9 }
  0x10   : > { %p147_p11 = scmp.eq.s32.totalorder %s146_s10, 0 }
  0x11   : > { %208 = sbr.rel (%p205_p10) target bundleno = 1317 (0x525), region = 40 }
  0x12   : > { %s3492_s11 = scalar_select %p147_p11, %s3358_s20, %s149_s9  }
  0x16   : > { %p232_p12 = scmp.lt.s32.totalorder %s3366_s22, 1  ;;  %s2844_s14 = sshll.u32 %s3362_s21, 3  ;;  %v3380_v0 = vmov 1983009808   ;;  %vm248_vm0 = vcmask 1047556   ;;  %vm659_vm1 = vcmask 1046528  }
  0x17   : > { %v253_v1 = vunpack.c.l.s4 %v3380_v0  ;;  %v3381_v13 = vmov 1934713408   ;;  %s3382_s27 = smov 127   ;;  %s3383_s30 = smov 64   ;;  %vm1076_vm2 = vcmask 1045504   ;;  %vm356_vm3 = vcmask 130048  }
  0x18   : > { %s233_s12 = scalar_select %p232_p12, %s3366_s22, 1  ;;  %v277_v14 = vunpack.c.l.s4 %v3381_v13  ;;  %vm358_vm4 = vcmask 261120   ;;  %vm360_vm5 = vcmask 392192   ;;  %vm362_vm6 = vcmask 523264  }
  0x19   : > { %v3520_v11 = vunpack.c.0.s8 %v253_v1  ;;  %s3384_s8 = smov 32   ;;  %s3385_s9 = smov 96   ;;  %vm364_vm7 = vcmask 654336   ;;  %vm366_vm8 = vcmask 785408   ;;  %vm368_vm9 = vcmask 916480  }
  0x1a   : > { %s2857_s13 = smul.u32 96, %s233_s12  ;;  %v3548_v29 = vunpack.c.0.s8 %v277_v14  ;;  %s3386_s10 = smov 48   ;;  %vm1517_vm10 = vcmask 1043456   ;;  %vm1533_vm11 = vcmask 293888  }
  0x1b   : > { %s3387_s12 = smov 16   ;;  %s3389_s15 = smov 112  }
  0x1c   : > { %s236_s17 = scalar_lea.vmem %s5205_s0, %s2857_s13  ;;  %s3388_s13 = smov 80  }
  0x1d   : > { %s238_s26 = scalar_lea.vmem %s236_s17, %s2844_s14  ;;  %s3390_s16 = smov 126  }
  0x1e   : > { %v3502_v2 = vld [vmem:[%s238_s26] sm:$0xff]  ;;  %v3504_v3 = vld [vmem:[%s238_s26 + $0x8] sm:$0xf]  ;;  %v3506_v4 = vld [vmem:[%s238_s26 + $0x38] sm:$0xf]  ;;  %s4454_s17 = sadd.s32 4294967295, %s2844_s14 }
  0x1f   : > { %v304_v5 = vrot.slane %v3506_v4, 4  ;;  %v3511_v6 = vpack.i.bf16 %v3504_v3, %v3502_v2  ;;  %v3513_v7 = vld [vmem:[%s238_s26 + $0x18] sm:$0xff]  ;;  %v3515_v8 = vld [vmem:[%s238_s26 + $0x30] sm:$0xff]  ;;  %v3517_v9 = vld [vmem:[%s238_s26 + $0x48] sm:$0xff]  ;;  %v250_v10 = vrot.slane %v3502_v2, 4  ;;  %v3598_v13 = vrot.slane %v3504_v3, 1 }
  0x20   : > { %v262_v12 = vrot.slane %v3513_v7, 4  ;;  %v247_v15 = vrot.slane %v3515_v8, 4  ;;  %v260_v16 = vrot.slane %v3517_v9, 4  ;;  %v242_v17 = vld [vmem:[%s238_s26 + $0x20] sm:$0xf]  ;;  %v663_v38 = vrot.slane %v3513_v7, 1 }
  0x21   : > { %v305_v18 = vsel %vm248_vm0, %v304_v5, %v3504_v3  ;;  %2943 = vrot.lane.b32.xlu1 %v3511_v6, %s3382_s27  ;;  %v251_v19 = vsel %vm248_vm0, %v3515_v8, %v250_v10  ;;  %v3531_v20 = vld [vmem:[%s238_s26 + $0x50] sm:$0xf]  ;;  %v3534_v21 = vpack.i.bf16 %v242_v17, %v3513_v7  ;;  %v3555_v39 = vrot.slane %v242_v17, 1  ;;  %s3392_s14 = smov 1  }
  0x22   : > { %v259_v22 = vperm.slane %v251_v19, %v3520_v11  ;;  %v263_v23 = vsel %vm248_vm0, %v3517_v9, %v262_v12  ;;  %v249_v24 = vsel %vm248_vm0, %v247_v15, %v3502_v2  ;;  %v261_v25 = vsel %vm248_vm0, %v260_v16, %v3513_v7 }
  0x23   : > { %v271_v26 = vperm.slane %v263_v23, %v3520_v11  ;;  %v255_v27 = vperm.slane %v249_v24, %v3520_v11  ;;  %v267_v28 = vperm.slane %v261_v25, %v3520_v11  ;;  %2948 = vrot.lane.b32.xlu2 %v3534_v21, %s3382_s27  ;;  %v309_v30 = vperm.slane %v305_v18, %v3520_v11 }
  0x24   : > { %v310_v31 = vrot.slane %v3531_v20, 4  ;;  %v286_v32 = vrot.slane %v259_v22, 4  ;;  %v669_v49 = vrot.slane %v3517_v9, 1  ;;  %v3569_v50 = vrot.slane %v3531_v20, 1 }
  0x25   : > { %v284_v33 = vrot.slane %v271_v26, 4  ;;  %v272_v34 = vrot.slane %v267_v28, 4  ;;  %v274_v35 = vrot.slane %v255_v27, 4  ;;  %v665_v52 = vsel %vm659_vm1, %v663_v38, %v3555_v39 }
  0x26   : > { %v311_v36 = vsel %vm248_vm0, %v310_v31, %v242_v17  ;;  %v287_v37 = vsel %vm248_vm0, %v271_v26, %v286_v32  ;;  %v694_v55 = vrot.slane %v665_v52, 4  ;;  %v671_v58 = vsel %vm659_vm1, %v669_v49, %v3569_v50 }
  0x27   : > { %v285_v40 = vsel %vm248_vm0, %v284_v33, %v259_v22  ;;  %v275_v41 = vsel %vm248_vm0, %v267_v28, %v274_v35  ;;  %v273_v42 = vsel %vm248_vm0, %v272_v34, %v255_v27  ;;  %v315_v43 = vperm.slane %v311_v36, %v3520_v11 }
  0x28   : > { %v291_v44 = vperm.slane %v285_v40, %v3548_v29  ;;  %v283_v45 = vperm.slane %v275_v41, %v3548_v29  ;;  %v3564_v46 = vperm.slane %v273_v42, %v3548_v29  ;;  %v295_v48 = vperm.slane %v287_v37, %v3548_v29 }
  0x29   : > { %v316_v47 = vrot.slane %v315_v43, 4  ;;  %v692_v59 = vrot.slane %v671_v58, 4  ;;  %v3584_v60 = vsel %vm248_vm0, %v671_v58, %v694_v55  ;;  %v1080_v1 = vrot.slane %v3513_v7, 2 }
  0x2a   : > { %337 = vrot.lane.b32.xlu1 %v291_v44, %s3383_s30  ;;  %329 = vrot.lane.b32.xlu0 %v283_v45, %s3384_s8  ;;  %v296_v51 = vrot.slane %v3564_v46, 4  ;;  %v298_v53 = vrot.slane %v283_v45, 4  ;;  %v300_v57 = vrot.slane %v291_v44, 4  ;;  %v3593_v5 = vrot.slane %v242_v17, 2 }
  0x2b   : > { %v317_v54 = vsel %vm248_vm0, %v316_v47, %v309_v30  ;;  %345 = vrot.lane.b32.xlu2 %v295_v48, %s3385_s9  ;;  %v3590_v0 = vsel %vm248_vm0, %v692_v59, %v665_v52  ;;  %v1086_v7 = vrot.slane %v3517_v9, 2  ;;  %v3607_v17 = vrot.slane %v3531_v20, 2 }
  0x2c   : > { %v3579_v56 = vperm.slane %v317_v54, %v3548_v29  ;;  %v297_v61 = vsel %vm248_vm0, 0.0, %v296_v51  ;;  %v299_v63 = vsel %vm248_vm0, 0.0, %v298_v53  ;;  %v301_v12 = vsel %vm248_vm0, 0.0, %v300_v57 }
  0x2d   : > { %v1082_v15 = vsel %vm1076_vm2, %v1080_v1, %v3593_v5  ;;  %v660_v18 = vrot.slane %v3502_v2, 1  ;;  %v666_v19 = vrot.slane %v3515_v8, 1  ;;  %v302_v22 = vrot.slane %v295_v48, 4 }
  0x2e   : > { %5225 = vst [vmem:[#allocation5_spill] sm:$0xff] %v3579_v56  ;;  %v322_v62 = vrot.slane %v3579_v56, 4  ;;  %v1111_v16 = vrot.slane %v1082_v15, 4  ;;  %v3612_v23 = vrot.slane %v3506_v4, 1  ;;  %v2962_v24 = vpack.i.bf16 %v3531_v20, %v3517_v9 }
  0x2f   : > { %v1088_v25 = vsel %vm1076_vm2, %v1086_v7, %v3607_v17  ;;  %v662_v26 = vsel %vm659_vm1, %v660_v18, %v3598_v13  ;;  %v2977_v32 = vpack.i.bf16 %v3506_v4, %v3515_v8  ;;  %v303_v9 = vsel %vm248_vm0, 0.0, %v302_v22 }
  0x30   : > { %v323_v10 = vsel %vm248_vm0, 0.0, %v322_v62  ;;  %v1109_v27 = vrot.slane %v1088_v25, 4  ;;  %v3621_v28 = vsel %vm248_vm0, %v1088_v25, %v1111_v16  ;;  %v668_v30 = vsel %vm659_vm1, %v666_v19, %v3612_v23 }
  0x31   : > { %v2952_v14 = vpack.i.bf16 %v323_v10, %v297_v61  ;;  %v682_v31 = vrot.slane %v662_v26, 4  ;;  %v680_v33 = vrot.slane %v668_v30, 4  ;;  %v1083_v36 = vrot.slane %v3515_v8, 2 }
  0x32   : > { %333 = vrot.lane.b32.xlu1 %v299_v63, %s3386_s10  ;;  %v3629_v20 = vsel %vm248_vm0, %v1109_v27, %v1082_v15  ;;  %v3646_v37 = vrot.slane %v3506_v4, 2  ;;  %v2987_v38 = vpack.i.bf16 %v665_v52, %v671_v58  ;;  %v3656_v42 = vrot.slane %v3504_v3, 2 }
  0x33   : > { %2953 = vrot.lane.b32.xlu0 %v2952_v14, %s3387_s12  ;;  %341 = vrot.lane.b32.xlu2 %v301_v12, %s3388_s13  ;;  %v3632_v34 = vsel %vm248_vm0, %v668_v30, %v682_v31  ;;  %v3635_v35 = vsel %vm248_vm0, %v680_v33, %v662_v26  ;;  %v3012_v45 = vpack.i.bf16 %v3555_v39, %v3569_v50 }
  0x34   : > { %v1085_v40 = vsel %vm1076_vm2, %v1083_v36, %v3646_v37  ;;  %v3017_v3 = vpack.i.bf16 %v3569_v50, %v3646_v37  ;;  %v3022_v47 = vpack.i.bf16 %v3598_v13, %v3612_v23  ;;  %v3027_v48 = vpack.i.bf16 %v3555_v39, %v3656_v42 }
  0x35   : > { %v1097_v41 = vrot.slane %v1085_v40, 4 }
  0x3a   : > { %2963 = vrot.lane.b32.xlu1 %v2962_v24, %s3382_s27 }
  0x3b   : > { %349 = vrot.lane.b32.xlu0 %v303_v9, %s3389_s15  ;;  %2978 = vrot.lane.b32.xlu2 %v2977_v32, %s3390_s16 }
  0x42   : > { %2973 = vrot.lane.b32.xlu1 %v3534_v21, %s3390_s16  ;;  %v1077_v21 = vrot.slane %v3502_v2, 2  ;;  %v3007_v2 = vpack.i.bf16 %v3593_v5, %v3607_v17 }
  0x43   : > { %2958 = vrot.lane.b32.xlu0 %v2977_v32, %s3382_s27  ;;  %1225 = vrot.lane.b32.xlu2 %v1088_v25, %s3382_s27 }
  0x44   : > { %v1079_v4 = vsel %vm1076_vm2, %v1077_v21, %v3656_v42 }
  0x45   : > { %v1098_v8 = vsel %vm248_vm0, %v1097_v41, %v1079_v4  ;;  %v1099_v43 = vrot.slane %v1079_v4, 4 }
  0x46   : > { %v1104_v7 = vperm.slane %v1098_v8, %v3520_v11 }
  0x47   : > { %v3662_v44 = vsel %vm248_vm0, %v1085_v40, %v1099_v43 }
  0x48   : > { %v1123_v31 = vrot.slane %v1104_v7, 4 }
  0x4a   : > { %2988 = vrot.lane.b32.xlu1 %v2987_v38, %s3390_s16 }
  0x4b   : > { %2968 = vrot.lane.b32.xlu0 %v3511_v6, %s3390_s16  ;;  %1217 = vrot.lane.b32.xlu2 %v1082_v15, %s3382_s27  ;;  %v2997_v6 = vpack.i.bf16 %v662_v26, %v668_v30 }
  0x52   : > { %1357 = vrot.lane.b32.xlu1 %v1082_v15, %s3390_s16 }
  0x53   : > { %2983 = vrot.lane.b32.xlu0 %v2962_v24, %s3390_s16  ;;  %1361 = vrot.lane.b32.xlu2 %v1085_v40, %s3390_s16 }
  0x5a   : > { %2998 = vrot.lane.b32.xlu1 %v2997_v6, %s3390_s16 }
  0x5b   : > { %1365 = vrot.lane.b32.xlu0 %v1088_v25, %s3390_s16  ;;  %1213 = vrot.lane.b32.xlu2 %v1079_v4, %s3382_s27 }
  0x62   : > { %3003 = vrot.lane.b32.xlu1 %v2997_v6, %s3382_s27 }
  0x63   : > { %1221 = vrot.lane.b32.xlu0 %v1085_v40, %s3382_s27  ;;  %3008 = vrot.lane.b32.xlu2 %v3007_v2, %s3382_s27  ;;  %v1116_v40 = vperm.slane %v3629_v20, %v3520_v11 }
  0x6a   : > { %3013 = vrot.lane.b32.xlu1 %v3012_v45, %s3390_s16 }
  0x6b   : > { %2993 = vrot.lane.b32.xlu0 %v2987_v38, %s3382_s27  ;;  %3018 = vrot.lane.b32.xlu2 %v3017_v3, %s3382_s27  ;;  %v1121_v3 = vrot.slane %v1116_v40, 4 }
  0x72   : > { %1363 = vrot.lane.b32.xlu1 %v3646_v37, %s3390_s16 }
  0x73   : > { %1353 = vrot.lane.b32.xlu0 %v1079_v4, %s3390_s16  ;;  %3023 = vrot.lane.b32.xlu2 %v3022_v47, %s3390_s16 }
  0x7a   : > { %1355 = vrot.lane.b32.xlu1 %v3656_v42, %s3390_s16 }
  0x7b   : > { %1367 = vrot.lane.b32.xlu0 %v3607_v17, %s3390_s16  ;;  %3033 = vrot.lane.b32.xlu2 %v3022_v47, %s3382_s27 }
  0x7d   : > { %v2949_v49 = vpop.permute.xlu2 %2948 }
  0x7e   : > { %v2950_v59 = vunpack.i.l.bf16 %v2949_v49  ;;  %v2951_v32 = vunpack.i.h.bf16 %v2949_v49 }
  0x80   : > { %v417_v10 = vrot.slane %v2950_v59, 4 }
  0x83   : > { %1359 = vrot.lane.b32.xlu0 %v3593_v5, %s3390_s16 }
  0x85   : > { %v3698_v52 = vpop.permute.xlu2 %345 }
  0x86   : > { %5226 = vst [vmem:[#allocation6_spill] sm:$0xff] %v3698_v52 }
  0x8b   : > { %3028 = vrot.lane.b32.xlu0 %v3027_v48, %s3382_s27 }
  0x8d   : > { %v3706_v57 = vpop.permute.xlu2 %341 }
  0x8e   : > { %5229 = vst [vmem:[#allocation9_spill] sm:$0xff] %v3706_v57 }
  0x93   : > { %v2944_v51 = vpop.permute.xlu1 %2943 }
  0x94   : > { %v2945_v14 = vunpack.i.l.bf16 %v2944_v51  ;;  %v2946_v43 = vunpack.i.h.bf16 %v2944_v51  ;;  %v3740_v51 = vsel %vm248_vm0, %v1121_v3, %v1104_v7 }
  0x95   : > { %v3712_v1 = vpop.permute.xlu2 %2978 }
  0x96   : > { %v405_v25 = vrot.slane %v2945_v14, 4  ;;  %v2981_v41 = vunpack.i.h.bf16 %v3712_v1 }
  0x9c   : > { %v3700_v53 = vpop.permute.xlu1 %337  ;;  %v3702_v54 = vpop.permute.xlu0 %329 }
  0x9d   : > { %5227 = vst [vmem:[#allocation7_spill] sm:$0xff] %v3700_v53  ;;  %v3725_v4 = vpop.permute.xlu2 %1225 }
  0xa4   : > { %v3704_v55 = vpop.permute.xlu1 %333 }
  0xa5   : > { %5228 = vst [vmem:[#allocation8_spill] sm:$0xff] %v3704_v55  ;;  %v3708_v58 = vpop.permute.xlu0 %2953 }
  0xac   : > { %v2964_v61 = vpop.permute.xlu1 %2963 }
  0xad   : > { %v2965_v62 = vunpack.i.l.bf16 %v2964_v61  ;;  %v3710_v63 = vpop.permute.xlu0 %349  ;;  %v2966_v15 = vunpack.i.h.bf16 %v2964_v61 }
  0xae   : > { %5230 = vst [vmem:[#allocation10_spill] sm:$0xff] %v3710_v63 }
  0xaf   : > { %v415_v12 = vrot.slane %v2965_v62, 4  ;;  %v418_v16 = vsel %vm248_vm0, %v2965_v62, %v417_v10  ;;  %v465_v26 = vrot.slane %v2966_v15, 4  ;;  %v3737_v62 = vsel %vm248_vm0, %v1116_v40, %v1123_v31 }
  0xb0   : > { %v426_v22 = vperm.slane %v418_v16, %v3520_v11  ;;  %v599_v10 = vrot.slane %v2981_v41, 4  ;;  %v2980_v31 = vunpack.i.l.bf16 %v3712_v1  ;;  %v3771_v41 = vpop.permute.xlu2 %1217 }
  0xb1   : > { %v416_v18 = vsel %vm248_vm0, %v415_v12, %v2950_v59  ;;  %v466_v6 = vsel %vm248_vm0, %v465_v26, %v2951_v32 }
  0xb2   : > { %v422_v33 = vperm.slane %v416_v18, %v3520_v11  ;;  %v439_v21 = vrot.slane %v426_v22, 4  ;;  %v470_v12 = vperm.slane %v466_v6, %v3520_v11 }
  0xb4   : > { %v3717_v19 = vpop.permute.xlu1 %2973  ;;  %v427_v45 = vrot.slane %v422_v33, 4 }
  0xb5   : > { %v2959_v24 = vpop.permute.xlu0 %2958 }
  0xb6   : > { %v2961_v27 = vunpack.i.h.bf16 %v2959_v24  ;;  %v2960_v30 = vunpack.i.l.bf16 %v2959_v24 }
  0xb8   : > { %v459_v9 = vrot.slane %v2961_v27, 4  ;;  %v403_v36 = vrot.slane %v2960_v30, 4  ;;  %v406_v38 = vsel %vm248_vm0, %v2960_v30, %v405_v25 }
  0xb9   : > { %v414_v8 = vperm.slane %v406_v38, %v3520_v11  ;;  %v471_v38 = vrot.slane %v470_v12, 4  ;;  %v543_v12 = vrot.slane %v2980_v31, 4 }
  0xba   : > { %v404_v2 = vsel %vm248_vm0, %v403_v36, %v2945_v14  ;;  %v460_v20 = vsel %vm248_vm0, %v459_v9, %v2946_v43  ;;  %v3763_v36 = vperm.slane %v3621_v28, %v3520_v11 }
  0xbb   : > { %v410_v47 = vperm.slane %v404_v2, %v3520_v11  ;;  %v440_v48 = vsel %vm248_vm0, %v439_v21, %v414_v8  ;;  %v441_v49 = vrot.slane %v414_v8, 4  ;;  %v464_v27 = vperm.slane %v460_v20, %v3520_v11 }
  0xbc   : > { %v3733_v59 = vpop.permute.xlu1 %2988  ;;  %v446_v61 = vperm.slane %v440_v48, %v3548_v29  ;;  %v1133_v6 = vrot.slane %v3763_v36, 4  ;;  %v3782_v2 = vperm.slane %v3662_v44, %v3520_v11 }
  0xbd   : > { %v2969_v14 = vpop.permute.xlu0 %2968  ;;  %v442_v15 = vsel %vm248_vm0, %v426_v22, %v441_v49  ;;  %v429_v16 = vrot.slane %v410_v47, 4  ;;  %v428_v26 = vsel %vm248_vm0, %v427_v45, %v410_v47  ;;  %v472_v21 = vsel %vm248_vm0, %v471_v38, %v464_v27 }
  0xbe   : > { %v2971_v18 = vunpack.i.h.bf16 %v2969_v14  ;;  %v2970_v24 = vunpack.i.l.bf16 %v2969_v14  ;;  %492 = vrot.lane.b32.xlu2 %v446_v61, %s3383_s30  ;;  %v3746_v25 = vperm.slane %v442_v15, %v3548_v29  ;;  %v3752_v30 = vperm.slane %v428_v26, %v3548_v29 }
  0xbf   : > { %v430_v7 = vsel %vm248_vm0, %v422_v33, %v429_v16  ;;  %v2975_v33 = vunpack.i.l.bf16 %v3717_v19  ;;  %v3777_v28 = vperm.slane %v472_v21, %v3548_v29  ;;  %v455_v47 = vrot.slane %v446_v61, 4 }
  0xc0   : > { %v3756_v22 = vsel %vm248_vm0, %v599_v10, %v2971_v18  ;;  %v545_v32 = vrot.slane %v2970_v24, 4  ;;  %500 = vrot.lane.b32.xlu1 %v3746_v25, %s3385_s9  ;;  %v438_v9 = vperm.slane %v430_v7, %v3548_v29  ;;  %v451_v1 = vrot.slane %v3752_v30, 4 }
  0xc1   : > { %5231 = vst [vmem:[#allocation11_spill] sm:$0xff] %v3777_v28  ;;  %v557_v3 = vrot.slane %v2975_v33, 4  ;;  %v477_v10 = vrot.slane %v3777_v28, 4  ;;  %v2976_v14 = vunpack.i.h.bf16 %v3717_v19  ;;  %v5213_v61 = vunpack.i.l.bf16 %v3733_v59 }
  0xc2   : > { %v3767_v40 = vsel %vm248_vm0, %v2980_v31, %v545_v32  ;;  %484 = vrot.lane.b32.xlu0 %v438_v9, %s3384_s8  ;;  %v453_v8 = vrot.slane %v438_v9, 4  ;;  %v452_v20 = vsel %vm248_vm0, 0.0, %v451_v1  ;;  %v456_v7 = vsel %vm248_vm0, 0.0, %v455_v47  ;;  %v3809_v1 = vpop.permute.xlu2 %1361 }
  0xc3   : > { %v478_v44 = vsel %vm248_vm0, 0.0, %v477_v10  ;;  %v544_v31 = vsel %vm248_vm0, %v543_v12, %v2970_v24  ;;  %v3803_v9 = vsel %vm248_vm0, %v1133_v6, %v3782_v2  ;;  %v972_v24 = vrot.slane %v5213_v61, 4 }
  0xc4   : > { %v3774_v43 = vpop.permute.xlu1 %1357  ;;  %v454_v15 = vsel %vm248_vm0, 0.0, %v453_v8  ;;  %v3037_v27 = vpack.i.bf16 %v478_v44, %v452_v20  ;;  %v1249_v47 = vrot.slane %v3725_v4, 4 }
  0xc5   : > { %v2984_v45 = vpop.permute.xlu0 %2983 }
  0xc6   : > { %v2986_v48 = vunpack.i.h.bf16 %v2984_v45  ;;  %v2985_v49 = vunpack.i.l.bf16 %v2984_v45  ;;  %3038 = vrot.lane.b32.xlu2 %v3037_v27, %s3387_s12  ;;  %v3824_v45 = vperm.slane %v3590_v0, %v3520_v11  ;;  %v687_v27 = vperm.slane %v3635_v35, %v3520_v11 }
  0xc7   : > { %v3859_v35 = vperm.slane %v3737_v62, %v3548_v29 }
  0xc8   : > { %v605_v16 = vrot.slane %v2986_v48, 4  ;;  %v555_v18 = vrot.slane %v2985_v49, 4  ;;  %v3789_v26 = vsel %vm248_vm0, %v2985_v49, %v557_v3  ;;  %488 = vrot.lane.b32.xlu1 %v454_v15, %s3386_s10  ;;  %v457_v48 = vrot.slane %v3746_v25, 4 }
  0xc9   : > { %v5216_v49 = vunpack.i.h.bf16 %v3733_v59  ;;  %v1250_v15 = vsel %vm248_vm0, %v1249_v47, %v3771_v41 }
  0xca   : > { %v3797_v19 = vsel %vm248_vm0, %v605_v16, %v2976_v14  ;;  %v556_v32 = vsel %vm248_vm0, %v555_v18, %v2975_v33  ;;  %496 = vrot.lane.b32.xlu0 %v456_v7, %s3388_s13  ;;  %v3816_v33 = vperm.slane %v544_v31, %v3520_v11  ;;  %v458_v18 = vsel %vm248_vm0, 0.0, %v457_v48 }
  0xcb   : > { %v3806_v38 = vperm.slane %v556_v32, %v3520_v11  ;;  %v973_v0 = vsel %vm248_vm0, %v972_v24, %v5216_v49  ;;  %v704_v7 = vrot.slane %v3824_v45, 4  ;;  %v1256_v47 = vperm.slane %v1250_v15, %v3520_v11 }
  0xcc   : > { %v3811_v21 = vpop.permute.xlu1 %2998  ;;  %v979_v31 = vperm.slane %v973_v0, %v3520_v11 }
  0xcd   : > { %v5211_v8 = vunpack.i.l.bf16 %v3811_v21  ;;  %v3819_v3 = vpop.permute.xlu0 %1365  ;;  %v567_v6 = vrot.slane %v3806_v38, 4  ;;  %v5212_v20 = vunpack.i.h.bf16 %v3811_v21 }
  0xce   : > { %504 = vrot.lane.b32.xlu2 %v458_v18, %s3389_s15 }
  0xcf   : > { %v960_v10 = vrot.slane %v5211_v8, 4  ;;  %v568_v12 = vsel %vm248_vm0, %v567_v6, %v3816_v33  ;;  %v1251_v6 = vrot.slane %v3771_v41, 4  ;;  %v984_v41 = vrot.slane %v979_v31, 4 }
  0xd0   : > { %v3835_v14 = vperm.slane %v568_v12, %v3548_v29  ;;  %v705_v12 = vsel %vm248_vm0, %v704_v7, %v687_v27 }
  0xd1   : > { %v961_v25 = vsel %vm248_vm0, %v960_v10, %v5212_v20  ;;  %v1214_v10 = vpop.permute.xlu2 %1213  ;;  %v1261_v20 = vrot.slane %v1256_v47, 4 }
  0xd2   : > { %5232 = vst [vmem:[#allocation12_spill] sm:$0xff] %v3835_v14  ;;  %v967_v16 = vperm.slane %v961_v25, %v3520_v11  ;;  %v591_v44 = vrot.slane %v3835_v14, 4  ;;  %v1239_v15 = vrot.slane %v1214_v10, 4 }
  0xd4   : > { %v986_v32 = vrot.slane %v967_v16, 4  ;;  %v592_v24 = vsel %vm248_vm0, 0.0, %v591_v44  ;;  %v3866_v44 = vpop.permute.xlu1 %3003 }
  0xd5   : > { %v1222_v48 = vpop.permute.xlu0 %1221  ;;  %620 = vrot.lane.b32.xlu1 %v592_v24, %s3387_s12  ;;  %v1252_v24 = vsel %vm248_vm0, %v3725_v4, %v1251_v6 }
  0xd6   : > { %v1237_v25 = vrot.slane %v1222_v48, 4  ;;  %v987_v0 = vsel %vm248_vm0, %v979_v31, %v986_v32  ;;  %v5214_v32 = vunpack.i.l.bf16 %v3866_v44  ;;  %v1240_v4 = vsel %vm248_vm0, %v1222_v48, %v1239_v15 }
  0xd7   : > { %v3864_v18 = vperm.slane %v987_v0, %v3548_v29  ;;  %v985_v0 = vsel %vm248_vm0, %v984_v41, %v967_v16 }
  0xd8   : > { %v1238_v8 = vsel %vm248_vm0, %v1237_v25, %v1214_v10  ;;  %v3879_v10 = vperm.slane %v1252_v24, %v3520_v11  ;;  %v1389_v25 = vrot.slane %v3819_v3, 4  ;;  %v706_v24 = vrot.slane %v687_v27, 4 }
  0xd9   : > { %v1244_v62 = vperm.slane %v1238_v8, %v3520_v11  ;;  %v3042_v7 = vpack.i.bf16 %v3859_v35, %v3864_v18  ;;  %v3887_v8 = vperm.slane %v3740_v51, %v3548_v29  ;;  %v820_v48 = vrot.slane %v5214_v32, 4 }
  0xda   : > { %v1273_v27 = vrot.slane %v3879_v10, 4 }
  0xdb   : > { %v1263_v61 = vrot.slane %v1244_v62, 4  ;;  %3043 = vrot.lane.b32.xlu0 %v3042_v7, %s3384_s8  ;;  %v1262_v31 = vsel %vm248_vm0, %v1261_v20, %v1244_v62  ;;  %v3894_v20 = vperm.slane %v985_v0, %v3548_v29  ;;  %v3902_v7 = vperm.slane %v1240_v4, %v3520_v11 }
  0xdc   : > { %v3883_v6 = vperm.slane %v1262_v31, %v3548_v29  ;;  %v1390_v0 = vsel %vm248_vm0, %v1389_v25, %v3774_v43  ;;  %v3915_v4 = vsel %vm248_vm0, %v3824_v45, %v706_v24  ;;  %v1377_v24 = vrot.slane %v3809_v1, 4 }
  0xdd   : > { %v3890_v16 = vpop.permute.xlu0 %2993  ;;  %v1264_v41 = vsel %vm248_vm0, %v1256_v47, %v1263_v61  ;;  %v5219_v47 = vunpack.i.h.bf16 %v3866_v44  ;;  %v1008_v56 = vrot.slane %v3894_v20, 4  ;;  %v1274_v45 = vsel %vm248_vm0, %v1273_v27, %v3902_v7 }
  0xde   : > { %v5215_v62 = vunpack.i.l.bf16 %v3890_v16  ;;  %v1272_v15 = vperm.slane %v1264_v41, %v3548_v29  ;;  %v1285_v51 = vrot.slane %v3883_v6, 4  ;;  %v5218_v31 = vunpack.i.h.bf16 %v3890_v16 }
  0xdf   : > { %v1145_v41 = vrot.slane %v3887_v8, 4  ;;  %v1009_v27 = vsel %vm248_vm0, 0.0, %v1008_v56  ;;  %v703_v56 = vperm.slane %v3584_v60, %v3520_v11 }
  0xe0   : > { %v832_v61 = vrot.slane %v5215_v62, 4  ;;  %1318 = vrot.lane.b32.xlu1 %v1272_v15, %s3384_s8  ;;  %v821_v62 = vsel %vm248_vm0, %v820_v48, %v5219_v47  ;;  %v1286_v49 = vsel %vm248_vm0, 0.0, %v1285_v51  ;;  %v1287_v14 = vrot.slane %v1272_v15, 4 }
  0xe1   : > { %v3938_v51 = vperm.slane %v821_v62, %v3520_v11  ;;  %v1146_v28 = vsel %vm248_vm0, 0.0, %v1145_v41  ;;  %v1010_v15 = vrot.slane %v3864_v18, 4 }
  0xe2   : > { %v833_v32 = vsel %vm248_vm0, %v832_v61, %v5218_v31  ;;  %v1396_v61 = vperm.slane %v1390_v0, %v3520_v11  ;;  %v3934_v31 = vperm.slane %v705_v12, %v3548_v29  ;;  %v3047_v52 = vpack.i.bf16 %v1146_v28, %v1009_v27 }
  0xe3   : > { %v3926_v25 = vperm.slane %v833_v32, %v3520_v11  ;;  %1314 = vrot.lane.b32.xlu0 %v1286_v49, %s3387_s12  ;;  %v3942_v49 = vperm.slane %v1274_v45, %v3548_v29 }
  0xe4   : > { %5233 = vst [vmem:[#allocation13_spill] sm:$0xff] %v3934_v31  ;;  %v1401_v63 = vrot.slane %v1396_v61, 4  ;;  %v728_v62 = vrot.slane %v3934_v31, 4  ;;  %v569_v31 = vrot.slane %v3816_v33, 4  ;;  %v1288_v33 = vsel %vm248_vm0, 0.0, %v1287_v14 }
  0xe5   : > { %v844_v48 = vrot.slane %v3926_v25, 4  ;;  %v1354_v47 = vpop.permute.xlu0 %1353  ;;  %v691_v14 = vperm.slane %v3632_v34, %v3520_v11 }
  0xe6   : > { %v1378_v32 = vsel %vm248_vm0, %v1377_v24, %v1354_v47  ;;  %v1379_v57 = vrot.slane %v1354_v47, 4  ;;  %v729_v27 = vsel %vm248_vm0, 0.0, %v728_v62  ;;  %v5236_v62 = vunpack.i.h.bf16 %v3811_v21 }
  0xe7   : > { %v1384_v0 = vperm.slane %v1378_v32, %v3520_v11  ;;  %v845_v12 = vsel %vm248_vm0, %v844_v48, %v3938_v51  ;;  %v1391_v48 = vrot.slane %v3774_v43, 4 }
  0xe8   : > { %1326 = vrot.lane.b32.xlu1 %v3942_v49, %s3383_s30  ;;  %v3953_v24 = vperm.slane %v845_v12, %v3548_v29  ;;  %v5234_v12 = vunpack.i.h.bf16 %v3733_v59  ;;  %v1380_v47 = vsel %vm248_vm0, %v3809_v1, %v1379_v57 }
  0xe9   : > { %v1403_v45 = vrot.slane %v1384_v0, 4  ;;  %v1402_v32 = vsel %vm248_vm0, %v1401_v63, %v1384_v0  ;;  %v566_v63 = vperm.slane %v3789_v26, %v3520_v11  ;;  %v3983_v26 = vsel %vm248_vm0, %v3806_v38, %v569_v31 }
  0xea   : > { %v868_v41 = vrot.slane %v3953_v24, 4  ;;  %v974_v55 = vrot.slane %v5234_v12, 4  ;;  %v3973_v43 = vperm.slane %v1402_v32, %v3548_v29  ;;  %v716_v38 = vrot.slane %v703_v56, 4 }
  0xeb   : > { %3048 = vrot.lane.b32.xlu0 %v3047_v52, %s3387_s12  ;;  %v1404_v53 = vsel %vm248_vm0, %v1396_v61, %v1403_v45  ;;  %v1392_v52 = vsel %vm248_vm0, %v3819_v3, %v1391_v48  ;;  %v5235_v3 = vunpack.i.l.bf16 %v3733_v59  ;;  %v962_v45 = vrot.slane %v5236_v62, 4 }
  0xec   : > { %v1412_v28 = vperm.slane %v1404_v53, %v3548_v29  ;;  %v869_v60 = vsel %vm248_vm0, 0.0, %v868_v41  ;;  %v1147_v53 = vrot.slane %v3859_v35, 4  ;;  %v3991_v18 = vperm.slane %v1392_v52, %v3520_v11 }
  0xed   : > { %v3052_v61 = vpack.i.bf16 %v869_v60, %v729_v27  ;;  %v975_v0 = vsel %vm248_vm0, %v5235_v3, %v974_v55  ;;  %v579_v57 = vrot.slane %v566_v63, 4  ;;  %v1425_v1 = vrot.slane %v3973_v43, 4 }
  0xee   : > { %1458 = vrot.lane.b32.xlu2 %v1412_v28, %s3384_s8  ;;  %v554_v59 = vperm.slane %v3767_v40, %v3520_v11  ;;  %v4000_v55 = vperm.slane %v1380_v47, %v3520_v11  ;;  %v846_v35 = vrot.slane %v3938_v51, 4  ;;  %v1011_v31 = vsel %vm248_vm0, 0.0, %v1010_v15 }
  0xef   : > { %v1148_v41 = vsel %vm248_vm0, 0.0, %v1147_v53  ;;  %v4007_v32 = vsel %vm248_vm0, %v716_v38, %v691_v14  ;;  %v4010_v34 = vperm.slane %v975_v0, %v3520_v11  ;;  %v5237_v48 = vunpack.i.l.bf16 %v3811_v21 }
  0xf0   : > { %1322 = vrot.lane.b32.xlu1 %v1288_v33, %s3386_s10  ;;  %v1413_v12 = vrot.slane %v3991_v18, 4  ;;  %v1426_v51 = vsel %vm248_vm0, 0.0, %v1425_v1  ;;  %v718_v27 = vrot.slane %v691_v14, 4  ;;  %v1135_v60 = vrot.slane %v3782_v2, 4 }
  0xf1   : > { %v963_v40 = vsel %vm248_vm0, %v5237_v48, %v962_v45  ;;  %v4019_v52 = vsel %vm248_vm0, %v579_v57, %v554_v59  ;;  %v610_v15 = vperm.slane %v3797_v19, %v3520_v11  ;;  %v3057_v53 = vpack.i.bf16 %v1148_v41, %v1011_v31 }
  0xf2   : > { %v1414_v21 = vsel %vm248_vm0, %v1413_v12, %v4000_v55  ;;  %v4027_v47 = vperm.slane %v963_v40, %v3520_v11  ;;  %v847_v33 = vsel %vm248_vm0, %v3926_v25, %v846_v35  ;;  %v4033_v2 = vsel %vm248_vm0, %v3763_v36, %v1135_v60 }
  0xf3   : > { %3053 = vrot.lane.b32.xlu0 %v3052_v61, %s3387_s12  ;;  %v996_v19 = vrot.slane %v4010_v34, 4  ;;  %v1420_v61 = vperm.slane %v1414_v21, %v3548_v29  ;;  %v1427_v3 = vrot.slane %v1412_v28, 4  ;;  %v4039_v0 = vsel %vm248_vm0, %v703_v56, %v718_v27  ;;  %v4050_v28 = vpop.permute.xlu2 %3008 }
  0xf4   : > { %v611_v62 = vrot.slane %v610_v15, 4  ;;  %v1275_v45 = vrot.slane %v3902_v7, 4  ;;  %v715_v25 = vperm.slane %v3915_v4, %v3548_v29  ;;  %v855_v57 = vperm.slane %v847_v33, %v3548_v29 }
  0xf5   : > { %v997_v36 = vsel %vm248_vm0, %v996_v19, %v4027_v47  ;;  %v604_v1 = vperm.slane %v3756_v22, %v3520_v11  ;;  %v1428_v56 = vsel %vm248_vm0, 0.0, %v1427_v3  ;;  %v1140_v7 = vperm.slane %v3803_v9, %v3548_v29 }
  0xf6   : > { %1454 = vrot.lane.b32.xlu2 %v1426_v51, %s3387_s12  ;;  %v581_v14 = vrot.slane %v554_v59, 4  ;;  %v3062_v4 = vpack.i.bf16 %v855_v57, %v715_v25  ;;  %v1276_v38 = vsel %vm248_vm0, %v3879_v10, %v1275_v45  ;;  %v1003_v35 = vperm.slane %v997_v36, %v3548_v29  ;;  %v4070_v10 = vpop.permute.xlu0 %1367 }
  0xf7   : > { %v4060_v31 = vsel %vm248_vm0, %v611_v62, %v604_v1  ;;  %v5238_v41 = vunpack.i.h.bf16 %v3890_v16  ;;  %v1284_v9 = vperm.slane %v1276_v38, %v3548_v29  ;;  %v1289_v59 = vrot.slane %v3942_v49, 4 }
  0xf8   : > { %3058 = vrot.lane.b32.xlu1 %v3057_v53, %s3386_s10  ;;  %v4063_v22 = vsel %vm248_vm0, %v566_v63, %v581_v14  ;;  %v1012_v40 = vrot.slane %v1003_v35, 4  ;;  %v1149_v12 = vrot.slane %v1140_v7, 4  ;;  %v1429_v51 = vrot.slane %v1420_v61, 4 }
  0xf9   : > { %v834_v48 = vrot.slane %v5238_v41, 4  ;;  %v5239_v27 = vunpack.i.l.bf16 %v3890_v16  ;;  %v1290_v60 = vsel %vm248_vm0, 0.0, %v1289_v59  ;;  %v5240_v15 = vunpack.i.h.bf16 %v3866_v44  ;;  %v3014_v59 = vpop.permute.xlu1 %3013 }
  0xfa   : > { %v1013_v49 = vsel %vm248_vm0, 0.0, %v1012_v40  ;;  %v1150_v33 = vsel %vm248_vm0, 0.0, %v1149_v12  ;;  %v1430_v16 = vsel %vm248_vm0, 0.0, %v1429_v51  ;;  %v5241_v3 = vunpack.i.l.bf16 %v3866_v44 }
  0xfb   : > { %1466 = vrot.lane.b32.xlu0 %v1420_v61, %s3383_s30  ;;  %v835_v63 = vsel %vm248_vm0, %v5239_v27, %v834_v48  ;;  %v822_v53 = vrot.slane %v5240_v15, 4  ;;  %v4079_v21 = vpop.permute.xlu2 %3018  ;;  %v3077_v61 = vpack.i.bf16 %v1150_v33, %v1013_v49  ;;  %v1415_v36 = vrot.slane %v4000_v55, 4 }
  0xfc   : > { %v4085_v19 = vperm.slane %v835_v63, %v3520_v11  ;;  %v1291_v1 = vrot.slane %v1284_v9, 4  ;;  %v730_v41 = vrot.slane %v715_v25, 4  ;;  %v870_v48 = vrot.slane %v855_v57, 4 }
  0xfd   : > { %v823_v62 = vsel %vm248_vm0, %v5241_v3, %v822_v53  ;;  %v998_v44 = vrot.slane %v4027_v47, 4  ;;  %v3015_v12 = vunpack.i.l.bf16 %v3014_v59  ;;  %v578_v47 = vperm.slane %v3983_v26, %v3548_v29 }
  0xfe   : > { %1462 = vrot.lane.b32.xlu2 %v1428_v56, %s3386_s10  ;;  %v856_v45 = vrot.slane %v4085_v19, 4  ;;  %v3067_v56 = vpack.i.bf16 %v1140_v7, %v1003_v35  ;;  %v4096_v14 = vperm.slane %v823_v62, %v3520_v11  ;;  %v4099_v38 = vpop.permute.xlu0 %1359  ;;  %v1292_v55 = vsel %vm248_vm0, 0.0, %v1291_v1 }
  0xff   : > { %v1416_v7 = vsel %vm248_vm0, %v3991_v18, %v1415_v36  ;;  %v3011_v35 = vunpack.i.h.bf16 %v4050_v28  ;;  %v731_v57 = vsel %vm248_vm0, 0.0, %v730_v41  ;;  %v871_v51 = vsel %vm248_vm0, 0.0, %v870_v48 }
 0x100   : > { %3063 = vrot.lane.b32.xlu1 %v3062_v4, %s3384_s8  ;;  %v3010_v4 = vunpack.i.l.bf16 %v4050_v28  ;;  %v4116_v27 = vperm.slane %v4007_v32, %v3548_v29  ;;  %v1424_v28 = vperm.slane %v1416_v7, %v3548_v29  ;;  %v999_v63 = vsel %vm248_vm0, %v4010_v34, %v998_v44 }
 0x101   : > { %v3016_v15 = vunpack.i.h.bf16 %v3014_v59  ;;  %v1022_v53 = vrot.slane %v3015_v12, 4  ;;  %v3072_v49 = vpack.i.bf16 %v871_v51, %v731_v57  ;;  %v4127_v33 = vperm.slane %v999_v63, %v3548_v29 }
 0x102   : > { %v1299_v25 = vrot.slane %v3010_v4, 4  ;;  %v1144_v34 = vperm.slane %v4033_v2, %v3548_v29  ;;  %v1159_v48 = vrot.slane %v3607_v17, 4  ;;  %v742_v7 = vrot.slane %v3569_v50, 4 }
 0x103   : > { %1334 = vrot.lane.b32.xlu0 %v1284_v9, %s3385_s9  ;;  %v857_v9 = vsel %vm248_vm0, %v856_v45, %v4096_v14  ;;  %v3024_v40 = vpop.permute.xlu2 %3023  ;;  %v1014_v41 = vrot.slane %v4127_v33, 4  ;;  %v1153_v17 = vrot.slane %v3646_v37, 4  ;;  %v736_v50 = vrot.slane %v3612_v23, 4 }
 0x104   : > { %v4119_v18 = vperm.slane %v857_v9, %v3548_v29  ;;  %v3025_v26 = vunpack.i.l.bf16 %v3024_v40  ;;  %v1300_v32 = vsel %vm248_vm0, %v1299_v25, %v3011_v35  ;;  %v3026_v45 = vunpack.i.h.bf16 %v3024_v40 }
 0x105   : > { %v1304_v4 = vperm.slane %v1300_v32, %v3520_v11  ;;  %v593_v9 = vrot.slane %v578_v47, 4  ;;  %v858_v35 = vrot.slane %v4096_v14, 4  ;;  %v3021_v40 = vunpack.i.h.bf16 %v4079_v21 }
 0x106   : > { %1330 = vrot.lane.b32.xlu2 %v1290_v60, %s3388_s13  ;;  %v3020_v60 = vunpack.i.l.bf16 %v4079_v21  ;;  %v3029_v62 = vpop.permute.xlu0 %3028  ;;  %v1016_v36 = vrot.slane %v3025_v26, 4  ;;  %v1015_v63 = vsel %vm248_vm0, 0.0, %v1014_v41  ;;  %v743_v14 = vsel %vm248_vm0, %v742_v7, %v3555_v39 }
 0x107   : > { %v3030_v1 = vunpack.i.l.bf16 %v3029_v62  ;;  %v1305_v57 = vrot.slane %v1304_v4, 4  ;;  %v1160_v21 = vsel %vm248_vm0, %v1159_v48, %v3593_v5  ;;  %v859_v23 = vsel %vm248_vm0, %v4085_v19, %v858_v35 }
 0x108   : > { %1470 = vrot.lane.b32.xlu1 %v1430_v16, %s3388_s13  ;;  %v3082_v16 = vpack.i.bf16 %v4119_v18, %v4116_v27  ;;  %v1293_v3 = vrot.slane %v3020_v60, 4  ;;  %v1017_v12 = vsel %vm248_vm0, %v1016_v36, %v3026_v45  ;;  %v747_v5 = vperm.slane %v743_v14, %v3520_v11 }
 0x109   : > { %v1021_v60 = vperm.slane %v1017_v12, %v3520_v11  ;;  %v1154_v45 = vsel %vm248_vm0, %v1153_v17, %v3656_v42  ;;  %v4178_v19 = vperm.slane %v4039_v0, %v3548_v29  ;;  %v3087_v4 = vpack.i.bf16 %v1144_v34, %v4127_v33 }
 0x10a   : > { %v1294_v25 = vsel %vm248_vm0, %v1293_v3, %v3030_v1  ;;  %v586_v3 = vperm.slane %v4019_v52, %v3548_v29  ;;  %v4181_v1 = vperm.slane %v859_v23, %v3548_v29  ;;  %v732_v42 = vrot.slane %v4116_v27, 4 }
 0x10b   : > { %3078 = vrot.lane.b32.xlu0 %v3077_v61, %s3388_s13  ;;  %v1431_v61 = vrot.slane %v1424_v28, 4  ;;  %v3034_v44 = vpop.permute.xlu2 %3033  ;;  %v1298_v37 = vperm.slane %v1294_v25, %v3520_v11  ;;  %v872_v41 = vrot.slane %v4119_v18, 4  ;;  %v1158_v0 = vperm.slane %v1154_v45, %v3520_v11 }
 0x10c   : > { %v3035_v51 = vunpack.i.l.bf16 %v3034_v44  ;;  %v3036_v39 = vunpack.i.h.bf16 %v3034_v44  ;;  %v748_v44 = vrot.slane %v747_v5, 4  ;;  %v734_v33 = vrot.slane %v4178_v19, 4 }
 0x10d   : > { %v1432_v59 = vsel %vm248_vm0, 0.0, %v1431_v61  ;;  %v1306_v52 = vsel %vm248_vm0, %v1305_v57, %v1298_v37  ;;  %v874_v27 = vrot.slane %v4181_v1, 4  ;;  %v733_v7 = vsel %vm248_vm0, 0.0, %v732_v42 }
 0x10e   : > { %3068 = vrot.lane.b32.xlu2 %v3067_v56, %s3383_s30  ;;  %v1023_v56 = vsel %vm248_vm0, %v1022_v53, %v3016_v15  ;;  %v594_v15 = vsel %vm248_vm0, 0.0, %v593_v9  ;;  %v882_v53 = vrot.slane %v3021_v40, 4  ;;  %v876_v61 = vrot.slane %v3035_v51, 4 }
 0x10f   : > { %v1027_v2 = vperm.slane %v1023_v56, %v3520_v11  ;;  %v4196_v9 = vperm.slane %v1306_v52, %v3548_v29  ;;  %v873_v35 = vsel %vm248_vm0, 0.0, %v872_v41  ;;  %v875_v14 = vsel %vm248_vm0, 0.0, %v874_v27 }
 0x110   : > { %1338 = vrot.lane.b32.xlu1 %v1292_v55, %s3389_s15  ;;  %v1151_v55 = vrot.slane %v1144_v34, 4  ;;  %v877_v18 = vsel %vm248_vm0, %v876_v61, %v3036_v39 }
 0x111   : > { %v1028_v26 = vrot.slane %v1027_v2, 4  ;;  %v1311_v51 = vrot.slane %v4196_v9, 4 }
 0x113   : > { %624 = vrot.lane.b32.xlu0 %v578_v47, %s3384_s8  ;;  %v1152_v47 = vsel %vm248_vm0, 0.0, %v1151_v55  ;;  %v1029_v56 = vsel %vm248_vm0, %v1028_v26, %v1021_v60  ;;  %v595_v55 = vrot.slane %v586_v3, 4  ;;  %v3092_v60 = vpack.i.bf16 %v873_v35, %v733_v7 }
 0x114   : > { %v3097_v32 = vpack.i.bf16 %v1152_v47, %v1015_v63  ;;  %v4193_v2 = vperm.slane %v1029_v56, %v3548_v29  ;;  %v1439_v63 = vrot.slane %v4070_v10, 4  ;;  %v881_v47 = vperm.slane %v877_v18, %v3520_v11 }
 0x115   : > { %v596_v17 = vsel %vm248_vm0, 0.0, %v595_v55 }
 0x116   : > { %3073 = vrot.lane.b32.xlu2 %v3072_v49, %s3386_s10  ;;  %v3031_v49 = vunpack.i.h.bf16 %v3029_v62  ;;  %v737_v62 = vsel %vm248_vm0, %v736_v50, %v3598_v13  ;;  %v1034_v57 = vrot.slane %v4193_v2, 4  ;;  %v735_v50 = vsel %vm248_vm0, 0.0, %v734_v33 }
 0x117   : > { %v741_v48 = vperm.slane %v737_v62, %v3520_v11  ;;  %v3107_v10 = vpack.i.bf16 %v875_v14, %v735_v50  ;;  %v1440_v23 = vsel %vm248_vm0, %v1439_v63, %v4099_v38 }
 0x118   : > { %3083 = vrot.lane.b32.xlu1 %v3082_v16, %s3383_s30  ;;  %v1164_v16 = vperm.slane %v1160_v21, %v3520_v11  ;;  %v4173_v36 = vpop.permute.xlu2 %492  ;;  %v883_v13 = vsel %vm248_vm0, %v882_v53, %v3031_v49  ;;  %v1035_v53 = vsel %vm248_vm0, 0.0, %v1034_v57  ;;  %v1312_v49 = vsel %vm248_vm0, 0.0, %v1311_v51 }
 0x119   : > { %v887_v34 = vperm.slane %v883_v13, %v3520_v11  ;;  %v749_v40 = vsel %vm248_vm0, %v748_v44, %v741_v48  ;;  %v3112_v62 = vpack.i.bf16 %v1035_v53, %v1312_v49  ;;  %v1444_v45 = vperm.slane %v1440_v23, %v3520_v11 }
 0x11a   : > { %v4216_v37 = vperm.slane %v749_v40, %v3548_v29  ;;  %v4251_v44 = vperm.slane %v4060_v31, %v3548_v29 }
 0x11b   : > { %1478 = vrot.lane.b32.xlu0 %v1432_v59, %s3389_s15  ;;  %v1165_v59 = vrot.slane %v1164_v16, 4  ;;  %v888_v21 = vrot.slane %v887_v34, 4 }
 0x11c   : > { %v754_v16 = vrot.slane %v4216_v37, 4 }
 0x11d   : > { %v1166_v12 = vsel %vm248_vm0, %v1165_v59, %v1158_v0  ;;  %v1445_v0 = vrot.slane %v1444_v45, 4 }
 0x11e   : > { %1474 = vrot.lane.b32.xlu2 %v1424_v28, %s3385_s9  ;;  %v4160_v28 = vpop.permute.xlu1 %1363  ;;  %v4219_v26 = vperm.slane %v1166_v12, %v3548_v29  ;;  %v755_v42 = vsel %vm248_vm0, 0.0, %v754_v16 }
 0x11f   : > { %v1433_v39 = vrot.slane %v4160_v28, 4 }
 0x120   : > { %628 = vrot.lane.b32.xlu1 %v594_v15, %s3386_s10  ;;  %v4221_v15 = vpop.permute.xlu2 %3038  ;;  %v1171_v61 = vrot.slane %v4219_v26, 4 }
 0x121   : > { %v3040_v5 = vunpack.i.l.bf16 %v4221_v15 }
 0x122   : > { %v1172_v41 = vsel %vm248_vm0, 0.0, %v1171_v61 }
 0x123   : > { %3098 = vrot.lane.b32.xlu0 %v3097_v32, %s3389_s15  ;;  %v590_v32 = vperm.slane %v4063_v22, %v3548_v29  ;;  %v511_v13 = vsel %vm356_vm3, %v3752_v30, %v3040_v5  ;;  %v3117_v55 = vpack.i.bf16 %v755_v42, %v1172_v41 }
 0x125   : > { %v597_v22 = vrot.slane %v590_v32, 4 }
 0x126   : > { %3088 = vrot.lane.b32.xlu2 %v3087_v4, %s3385_s9  ;;  %v1356_v25 = vpop.permute.xlu1 %1355  ;;  %v3102_v4 = vpack.i.bf16 %v4181_v1, %v4178_v19  ;;  %v617_v1 = vrot.slane %v4251_v44, 4 }
 0x127   : > { %v1434_v28 = vsel %vm248_vm0, %v1433_v39, %v1356_v25  ;;  %v598_v30 = vsel %vm248_vm0, 0.0, %v597_v22 }
 0x128   : > { %632 = vrot.lane.b32.xlu1 %v586_v3, %s3383_s30  ;;  %v889_v3 = vsel %vm248_vm0, %v888_v21, %v881_v47  ;;  %v1438_v59 = vperm.slane %v1434_v28, %v3520_v11  ;;  %v618_v40 = vsel %vm248_vm0, 0.0, %v617_v1  ;;  %v505_v57 = vpop.permute.xlu2 %504 }
 0x129   : > { %v4240_v56 = vperm.slane %v889_v3, %v3548_v29 }
 0x12a   : > { %v1446_v27 = vsel %vm248_vm0, %v1445_v0, %v1438_v59 }
 0x12b   : > { %636 = vrot.lane.b32.xlu0 %v596_v17, %s3388_s13  ;;  %v894_v19 = vrot.slane %v4240_v56, 4  ;;  %v4268_v12 = vperm.slane %v1446_v27, %v3548_v29 }
 0x12d   : > { %v895_v18 = vsel %vm248_vm0, 0.0, %v894_v19  ;;  %v1451_v51 = vrot.slane %v4268_v12, 4 }
 0x12e   : > { %3093 = vrot.lane.b32.xlu2 %v3092_v60, %s3388_s13  ;;  %v3122_v17 = vpack.i.bf16 %v618_v40, %v895_v18 }
 0x130   : > { %3108 = vrot.lane.b32.xlu1 %v3107_v10, %s3389_s15 }
 0x132   : > { %v501_v38 = vpop.permute.xlu1 %500 }
 0x133   : > { %3113 = vrot.lane.b32.xlu0 %v3112_v62, %s3387_s12 }
 0x134   : > { %v485_v52 = vpop.permute.xlu0 %484 }
 0x135   : > { %v512_v48 = vsel %vm358_vm4, %v511_v13, %v485_v52 }
 0x136   : > { %3103 = vrot.lane.b32.xlu2 %v3102_v4, %s3385_s9 }
 0x138   : > { %644 = vrot.lane.b32.xlu1 %v598_v30, %s3389_s15 }
 0x13a   : > { %v489_v33 = vpop.permute.xlu1 %488 }
 0x13b   : > { %v513_v31 = vsel %vm360_vm5, %v512_v48, %v489_v33  ;;  %3118 = vrot.lane.b32.xlu0 %v3117_v55, %s3387_s12 }
 0x13c   : > { %v497_v34 = vpop.permute.xlu0 %496  ;;  %v514_v7 = vsel %vm362_vm6, %v513_v31, %v4173_v36  ;;  %v1452_v36 = vsel %vm248_vm0, 0.0, %v1451_v51 }
 0x13d   : > { %v515_v35 = vsel %vm364_vm7, %v514_v7, %v497_v34 }
 0x13e   : > { %v516_v25 = vsel %vm366_vm8, %v515_v35, %v501_v38  ;;  %640 = vrot.lane.b32.xlu2 %v590_v32, %s3385_s9 }
 0x13f   : > { %v4281_v10 = vsel %vm368_vm9, %v516_v25, %v505_v57 }
 0x140   : > { %3123 = vrot.lane.b32.xlu1 %v3122_v17, %s3387_s12 }
 0x146   : > { %1482 = vrot.lane.b32.xlu2 %v1452_v36, %s3387_s12 }
 0x147   : > { %v4276_v47 = vpop.permute.xlu1 %620 }
 0x148   : > { %v1459_v63 = vpop.permute.xlu2 %1458 }
 0x14d   : > { %v4278_v50 = vpop.permute.xlu0 %3043 }
 0x150   : > { %v1455_v14 = vpop.permute.xlu2 %1454 }
 0x151   : > { %v1485_v42 = vsel %vm356_vm3, %v3973_v43, %v1455_v14 }
 0x152   : > { %v1319_v21 = vpop.permute.xlu1 %1318  ;;  %v1486_v48 = vsel %vm358_vm4, %v1485_v42, %v1459_v63 }
 0x155   : > { %v1315_v60 = vpop.permute.xlu0 %1314 }
 0x156   : > { %v1345_v0 = vsel %vm356_vm3, %v3883_v6, %v1315_v60  ;;  %v3046_v6 = vunpack.i.h.bf16 %v4278_v50 }
 0x157   : > { %v1346_v43 = vsel %vm358_vm4, %v1345_v0, %v1319_v21  ;;  %v2955_v21 = vunpack.i.l.bf16 %v3708_v58 }
 0x158   : > { %v1463_v53 = vpop.permute.xlu2 %1462 }
 0x159   : > { %v1487_v59 = vsel %vm360_vm5, %v1486_v48, %v1463_v53 }
 0x15a   : > { %v1327_v49 = vpop.permute.xlu1 %1326 }
 0x15d   : > { %v3049_v23 = vpop.permute.xlu0 %3048 }
 0x15e   : > { %v3051_v30 = vunpack.i.h.bf16 %v3049_v23  ;;  %v3050_v17 = vunpack.i.l.bf16 %v3049_v23 }
 0x160   : > { %v1331_v39 = vpop.permute.xlu2 %1330  ;;  %v1205_v27 = vsel %vm356_vm3, %v3887_v8, %v3051_v30  ;;  %v1068_v23 = vsel %vm356_vm3, %v3894_v20, %v3050_v17  ;;  %v357_v20 = vsel %vm356_vm3, %v3564_v46, %v2955_v21  ;;  %v3391_v17 = vmov 0  }
 0x161   : > { %v1206_v25 = vsel %vm358_vm4, %v1205_v27, %v3046_v6  ;;  %v359_v46 = vsel %vm358_vm4, %v357_v20, %v3702_v54  ;;  %3127 = vset.pattern.permute.xlu2 %v3391_v17  ;;  %3283 = vset.pattern.permute.xlu0 %v3391_v17 }
 0x162   : > { %v1323_v32 = vpop.permute.xlu1 %1322 }
 0x163   : > { %v1347_v31 = vsel %vm360_vm5, %v1346_v43, %v1323_v32 }
 0x164   : > { %v1348_v40 = vsel %vm362_vm6, %v1347_v31, %v1327_v49 }
 0x165   : > { %v4283_v5 = vpop.permute.xlu0 %3053  ;;  %v1349_v63 = vsel %vm364_vm7, %v1348_v40, %v1331_v39  ;;  %v3045_v39 = vunpack.i.l.bf16 %v4278_v50 }
 0x166   : > { %v3056_v48 = vunpack.i.h.bf16 %v4283_v5 }
 0x168   : > { %v4285_v16 = vpop.permute.xlu2 %3068  ;;  %v928_v6 = vsel %vm356_vm3, %v3953_v24, %v3056_v48 }
 0x169   : > { %v3071_v36 = vunpack.i.h.bf16 %v4285_v16 }
 0x16a   : > { %v3059_v61 = vpop.permute.xlu1 %3058 }
 0x16b   : > { %v3061_v18 = vunpack.i.h.bf16 %v3059_v61  ;;  %v3060_v32 = vunpack.i.l.bf16 %v3059_v61 }
 0x16d   : > { %v1467_v3 = vpop.permute.xlu0 %1466  ;;  %v1207_v8 = vsel %vm360_vm5, %v1206_v25, %v3061_v18 }
 0x16e   : > { %v1488_v19 = vsel %vm362_vm6, %v1487_v59, %v1467_v3  ;;  %v1208_v53 = vsel %vm362_vm6, %v1207_v8, %v3071_v36 }
 0x170   : > { %v4287_v62 = vpop.permute.xlu2 %3073 }
 0x171   : > { %v3076_v54 = vunpack.i.h.bf16 %v4287_v62 }
 0x172   : > { %v4289_v45 = vpop.permute.xlu1 %3063 }
 0x173   : > { %v3065_v31 = vunpack.i.l.bf16 %v4289_v45 }
 0x175   : > { %v1335_v38 = vpop.permute.xlu0 %1334 }
 0x176   : > { %v1350_v60 = vsel %vm366_vm8, %v1349_v63, %v1335_v38  ;;  %v1069_v38 = vsel %vm358_vm4, %v1068_v23, %v3045_v39  ;;  %v5243_v63 = vld [vmem:[#allocation8_spill] sm:$0xff] }
 0x177   : > { %v1070_v61 = vsel %vm360_vm5, %v1069_v38, %v3060_v32  ;;  %v361_v21 = vsel %vm360_vm5, %v359_v46, %v5243_v63  ;;  %v5244_v39 = vld [vmem:[#allocation12_spill] sm:$0xff]  ;;  %v3041_v63 = vunpack.i.h.bf16 %v4221_v15  ;;  %v5249_v15 = vld [vmem:[#allocation11_spill] sm:$0xff] }
 0x178   : > { %v1475_v28 = vpop.permute.xlu2 %1474 }
 0x17a   : > { %v1471_v22 = vpop.permute.xlu1 %1470 }
 0x17b   : > { %v1489_v1 = vsel %vm364_vm7, %v1488_v19, %v1471_v22  ;;  %v3055_v19 = vunpack.i.l.bf16 %v4283_v5 }
 0x17c   : > { %v1490_v7 = vsel %vm366_vm8, %v1489_v1, %v1475_v28  ;;  %v3070_v1 = vunpack.i.l.bf16 %v4285_v16 }
 0x17d   : > { %v4291_v52 = vpop.permute.xlu0 %3078 }
 0x17e   : > { %v3081_v57 = vunpack.i.h.bf16 %v4291_v52  ;;  %v3080_v43 = vunpack.i.l.bf16 %v4291_v52 }
 0x180   : > { %v4293_v13 = vpop.permute.xlu2 %3088  ;;  %v1209_v3 = vsel %vm364_vm7, %v1208_v53, %v3081_v57  ;;  %v3075_v57 = vunpack.i.l.bf16 %v4287_v62 }
 0x181   : > { %v3091_v49 = vunpack.i.h.bf16 %v4293_v13  ;;  %v3090_v16 = vunpack.i.l.bf16 %v4293_v13 }
 0x182   : > { %v1339_v4 = vpop.permute.xlu1 %1338 }
 0x183   : > { %v4335_v28 = vsel %vm368_vm9, %v1350_v60, %v1339_v4  ;;  %v1210_v59 = vsel %vm366_vm8, %v1209_v3, %v3091_v49  ;;  %v3066_v4 = vunpack.i.h.bf16 %v4289_v45  ;;  %v1527_v45 = vld [vmem:[%s5207_s2] sm:$0xf] }
 0x184   : > { %v1513_v0 = vrot.slane %v4335_v28, 4  ;;  %1530 = vperm.xlu2 %3127, %v1527_v45  }
 0x185   : > { %v4297_v41 = vpop.permute.xlu0 %624  ;;  %v929_v5 = vsel %vm358_vm4, %v928_v6, %v3066_v4  ;;  %v5246_v6 = vld [vmem:[#allocation9_spill] sm:$0xff] }
 0x186   : > { %v930_v36 = vsel %vm360_vm5, %v929_v5, %v3076_v54 }
 0x188   : > { %v4303_v55 = vpop.permute.xlu2 %3093 }
 0x189   : > { %v3096_v32 = vunpack.i.h.bf16 %v4303_v55 }
 0x18a   : > { %v4307_v33 = vpop.permute.xlu1 %3083 }
 0x18b   : > { %v3086_v52 = vunpack.i.h.bf16 %v4307_v33  ;;  %v3085_v8 = vunpack.i.l.bf16 %v4307_v33 }
 0x18d   : > { %v1479_v34 = vpop.permute.xlu0 %1478  ;;  %v931_v53 = vsel %vm362_vm6, %v930_v36, %v3086_v52  ;;  %v5247_v52 = vld [vmem:[#allocation6_spill] sm:$0xff] }
 0x18e   : > { %v1491_v35 = vsel %vm368_vm9, %v1490_v7, %v1479_v34  ;;  %v1071_v34 = vsel %vm362_vm6, %v1070_v61, %v3070_v1  ;;  %v5242_v7 = vld [vmem:[#allocation13_spill] sm:$0xff]  ;;  %v932_v61 = vsel %vm364_vm7, %v931_v53, %v3096_v32 }
 0x18f   : > { %2845 = vmatpush.msk.msra.mxu0 %vm1517_vm10, %v1491_v35  ;;  %v788_v35 = vsel %vm356_vm3, %v5242_v7, %v3055_v19  ;;  %v1072_v40 = vsel %vm364_vm7, %v1071_v34, %v3080_v43 }
 0x190   : > { %v4321_v51 = vpop.permute.xlu2 %3103  ;;  %v789_v13 = vsel %vm358_vm4, %v788_v35, %v3065_v31  ;;  %v1073_v60 = vsel %vm366_vm8, %v1072_v40, %v3090_v16 }
 0x191   : > { %v3106_v49 = vunpack.i.h.bf16 %v4321_v51  ;;  %v790_v3 = vsel %vm360_vm5, %v789_v13, %v3075_v57  ;;  %v3105_v48 = vunpack.i.l.bf16 %v4321_v51 }
 0x192   : > { %v4325_v14 = vpop.permute.xlu1 %628 }
 0x195   : > { %v3099_v22 = vpop.permute.xlu0 %3098 }
 0x196   : > { %v3101_v42 = vunpack.i.h.bf16 %v3099_v22  ;;  %v3100_v24 = vunpack.i.l.bf16 %v3099_v22  ;;  %v651_v22 = vsel %vm356_vm3, %v5244_v39, %v4276_v47  ;;  %v933_v47 = vsel %vm366_vm8, %v932_v61, %v3106_v49 }
 0x198   : > { %v4346_v30 = vpop.permute.xlu2 %640  ;;  %v1211_v50 = vsel %vm368_vm9, %v1210_v59, %v3101_v42  ;;  %v1074_v62 = vsel %vm368_vm9, %v1073_v60, %v3100_v24  ;;  %v791_v42 = vsel %vm362_vm6, %v790_v3, %v3085_v8 }
 0x199   : > { %v1524_v27 = vsel %vm1517_vm10, %v1211_v50, %v1513_v0  ;;  %v3095_v0 = vunpack.i.l.bf16 %v4303_v55  ;;  %v652_v50 = vsel %vm358_vm4, %v651_v22, %v4297_v41  ;;  %v1507_v19 = vrot.slane %v1074_v62, 4 }
 0x19a   : > { %v633_v18 = vpop.permute.xlu1 %632  ;;  %1555 = vmatpush.msra.mxu0 %v1524_v27  ;;  %v653_v1 = vsel %vm360_vm5, %v652_v50, %v4325_v14  ;;  %v2956_v22 = vunpack.i.h.bf16 %v3708_v58  ;;  %v1691_v50 = vlaneseq }
 0x19b   : > { %v792_v51 = vsel %vm364_vm7, %v791_v42, %v3095_v0  ;;  %v654_v31 = vsel %vm362_vm6, %v653_v1, %v633_v18  ;;  %v1495_v18 = vrot.slane %v4281_v10, 4 }
 0x19c   : > { %v793_v27 = vsel %vm366_vm8, %v792_v51, %v3105_v48 }
 0x19d   : > { %v637_v25 = vpop.permute.xlu0 %636 }
 0x19e   : > { %v655_v34 = vsel %vm364_vm7, %v654_v31, %v637_v25  ;;  %v5248_v25 = vld [vmem:[#allocation10_spill] sm:$0xff] }
 0x19f   : > { %v656_v7 = vsel %vm366_vm8, %v655_v34, %v4346_v30  ;;  %v1526_v30 = vld [vmem:[%s5206_s1] sm:$0xf] }
 0x1a0   : > { %v1483_v23 = vpop.permute.xlu2 %1482 }
 0x1a1   : > { %v1492_v33 = vsel %vm356_vm3, %v4268_v12, %v1483_v23  ;;  %v5245_v12 = vld [vmem:[#allocation7_spill] sm:$0xff] }
 0x1a2   : > { %v3109_v38 = vpop.permute.xlu1 %3108  ;;  %2847 = vmatpush.msk.msra.mxu1 %vm1517_vm10, %v1492_v33  ;;  %v363_v4 = vsel %vm362_vm6, %v361_v21, %v5245_v12  ;;  %v518_v33 = vsel %vm356_vm3, %v5249_v15, %v3041_v63 }
 0x1a3   : > { %v3111_v59 = vunpack.i.h.bf16 %v3109_v38  ;;  %v3110_v20 = vunpack.i.l.bf16 %v3109_v38  ;;  %v365_v41 = vsel %vm364_vm7, %v363_v4, %v5246_v6  ;;  %v5250_v38 = vld [vmem:[#allocation5_spill] sm:$0xff] }
 0x1a4   : > { %v367_v14 = vsel %vm366_vm8, %v365_v41, %v5247_v52  ;;  %v370_v0 = vsel %vm356_vm3, %v5250_v38, %v2956_v22 }
 0x1a5   : > { %v3114_v43 = vpop.permute.xlu0 %3113  ;;  %v934_v55 = vsel %vm368_vm9, %v933_v47, %v3111_v59  ;;  %v794_v5 = vsel %vm368_vm9, %v793_v27, %v3110_v20  ;;  %v369_v17 = vsel %vm368_vm9, %v367_v14, %v5248_v25 }
 0x1a6   : > { %v1522_v46 = vsel %vm1517_vm10, %v934_v55, %v1507_v19  ;;  %v3115_v16 = vunpack.i.l.bf16 %v3114_v43  ;;  %v1501_v35 = vrot.slane %v794_v5, 4  ;;  %v3116_v13 = vunpack.i.h.bf16 %v3114_v43 }
 0x1a7   : > { %1556 = vmatpush.msra.mxu0 %v1522_v46  ;;  %v1518_v36 = vsel %vm1517_vm10, %v369_v17, %v1495_v18  ;;  %v1692_v19 = vshrl.u32 %v1691_v50, 7  ;;  %v1695_v43 = vstv %s4454_s17 }
 0x1a8   : > { %v1352_v24 = vsel %vm356_vm3, %v4196_v9, %v3115_v16  ;;  %v1075_v53 = vsel %vm356_vm3, %v4193_v2, %v3116_v13 }
 0x1a9   : > { %v1514_v21 = vrot.slane %v1352_v24, 4  ;;  %v1508_v62 = vrot.slane %v1075_v53, 4  ;;  %v1693_v1 = vadd.s32 8, %v1692_v19 }
 0x1aa   : > { %v645_v45 = vpop.permute.xlu1 %644 }
 0x1ab   : > { %v657_v54 = vsel %vm368_vm9, %v656_v7, %v645_v45  ;;  %v1697_v27 = vadd.s32 %v1695_v43, %v1693_v1 }
 0x1ac   : > { %v1520_v40 = vsel %vm1517_vm10, %v657_v54, %v1501_v35 }
 0x1ad   : > { %1557 = vmatpush.msra.mxu0 %v1520_v40  ;;  %v3119_v8 = vpop.permute.xlu0 %3118  ;;  %vm1699_vm12 = vcmp.ge.s32.totalorder %v1697_v27, 0  ;;  %vm1701_vm13 = vcmp.lt.s32.totalorder %v1697_v27, 16 }
 0x1ae   : > { %v3121_v57 = vunpack.i.h.bf16 %v3119_v8  ;;  %v3120_v10 = vunpack.i.l.bf16 %v3119_v8  ;;  %vm4460_vm14 = vmand %vm1699_vm12, %vm1701_vm13 }
 0x1af   : > { %1558 = vmatpush.msra.mxu0 %v1518_v36 }
 0x1b0   : > { %2846 = vmatmul.msk.f32.vlgmr.msra.gmra.mxu0 %vm1533_vm11, %v1526_v30  ;;  %v1212_v9 = vsel %vm356_vm3, %v4219_v26, %v3120_v10  ;;  %v795_v49 = vsel %vm356_vm3, %v4216_v37, %v3121_v57  ;;  %v1496_v37 = vrot.slane %v518_v33, 4 }
 0x1b1   : > { %v1525_v60 = vsel %vm1517_vm10, %v1212_v9, %v1514_v21  ;;  %v1502_v39 = vrot.slane %v795_v49, 4  ;;  %v1696_v49 = vadd.s32 %v1695_v43, %v1692_v19 }
 0x1b2   : > { %v3124_v23 = vpop.permute.xlu1 %3123  ;;  %1575 = vmatpush.msra.mxu1 %v1525_v60  ;;  %v1519_v59 = vsel %vm1517_vm10, %v370_v0, %v1496_v37 }
 0x1b3   : > { %v3126_v32 = vunpack.i.h.bf16 %v3124_v23  ;;  %v3125_v3 = vunpack.i.l.bf16 %v3124_v23  ;;  %vm1698_vm15 = vcmp.ge.s32.totalorder %v1696_v49, 0  ;;  %vm1700_vm12 = vcmp.lt.s32.totalorder %v1696_v49, 16 }
 0x1b4   : > { %vm4493_vm13 = vmand %vm1698_vm15, %vm1700_vm12  ;;  %vm1753_vm15 = vcmask 138240  }
 0x1b5   : > { %v935_v26 = vsel %vm356_vm3, %v4240_v56, %v3125_v3  ;;  %v658_v2 = vsel %vm356_vm3, %v4251_v44, %v3126_v32 }
 0x1b6   : > { %v1523_v42 = vsel %vm1517_vm10, %v935_v26, %v1508_v62  ;;  %v1521_v48 = vsel %vm1517_vm10, %v658_v2, %v1502_v39 }
 0x1b7   : > { %1576 = vmatpush.msra.mxu1 %v1523_v42 }
 0x1b9   : > { %1577 = vmatpush.msra.mxu1 %v1521_v48 }
 0x1bb   : > { %1578 = vmatpush.msra.mxu1 %v1519_v59 }
 0x1bc   : > { %2848 = vmatmul.msk.f32.vlgmr.msra.gmra.mxu1 %vm1533_vm11, %v1526_v30 }
 0x1de   : > { %v1531_v58 = vpop.permute.xlu2 %1530 }
 0x22d   : > { %v1560_v56 = vpop.f32.mrf.mxu0 }
 0x22e   : > { %v1561_v20 = vadd.f32 %v1560_v56, %v1531_v58 }
 0x230   : > { %v1583_v44 = vmax.f32 %v1561_v20, 0.0 }
 0x232   : > { %1592 = vrot.lane.b32.xlu1 %v1583_v44, %s3388_s13  ;;  %1601 = vrot.lane.b32.xlu2 %v1583_v44, %s3384_s8 }
 0x239   : > { %v1580_v61 = vpop.f32.mrf.mxu1 }
 0x23a   : > { %v1581_v12 = vadd.f32 %v1580_v61, %v1531_v58  ;;  %1595 = vrot.lane.b32.xlu1 %v1583_v44, %s3383_s30  ;;  %1604 = vrot.lane.b32.xlu2 %v1583_v44, %s3387_s12 }
 0x23c   : > { %v1584_v4 = vmax.f32 %v1581_v12, 0.0 }
 0x23e   : > { %1608 = vrot.lane.b32.xlu0 %v1584_v4, %s3389_s15  ;;  %v1669_v31 = vperm.slane %v1584_v4, %v3520_v11 }
 0x240   : > { %v1677_v6 = vrot.slane %v1669_v31, 4 }
 0x242   : > { %1598 = vrot.lane.b32.xlu1 %v1583_v44, %s3386_s10 }
 0x246   : > { %1589 = vrot.lane.b32.xlu0 %v1583_v44, %s3385_s9 }
 0x24e   : > { %1586 = vrot.lane.b32.xlu0 %v1583_v44, %s3389_s15 }
 0x28c   : > { %v1602_v51 = vpop.permute.xlu2 %1601 }
 0x28d   : > { %v1622_v5 = vrot.slane %v1602_v51, 4 }
 0x294   : > { %v1605_v34 = vpop.permute.xlu2 %1604 }
 0x295   : > { %v1628_v35 = vrot.slane %v1605_v34, 4 }
 0x2a4   : > { %v1593_v47 = vpop.permute.xlu1 %1592 }
 0x2a5   : > { %v1616_v3 = vrot.slane %v1593_v47, 4 }
 0x2ac   : > { %v1596_v55 = vpop.permute.xlu1 %1595 }
 0x2ad   : > { %v1623_v18 = vsel %vm248_vm0, %v1622_v5, %v1596_v55 }
 0x2ae   : > { %v1627_v17 = vperm.slane %v1623_v18, %v3520_v11 }
 0x2b0   : > { %v1609_v46 = vpop.permute.xlu0 %1608  ;;  %v1648_v60 = vrot.slane %v1627_v17, 4 }
 0x2b1   : > { %v1674_v41 = vperm.slane %v1609_v46, %v3520_v11 }
 0x2b3   : > { %v1675_v16 = vrot.slane %v1674_v41, 4  ;;  %v1678_v52 = vsel %vm248_vm0, %v1674_v41, %v1677_v6 }
 0x2b4   : > { %v1599_v45 = vpop.permute.xlu1 %1598  ;;  %v1686_v7 = vperm.slane %v1678_v52, %v3548_v29 }
 0x2b5   : > { %v1676_v54 = vsel %vm248_vm0, %v1675_v16, %v1669_v31  ;;  %v1629_v25 = vsel %vm248_vm0, %v1628_v35, %v1599_v45 }
 0x2b6   : > { %v1709_v40 = vsel %vm4460_vm14, %v1686_v7, 0.0  ;;  %v1682_v24 = vperm.slane %v1676_v54, %v3548_v29  ;;  %v1689_v10 = vrot.slane %v1686_v7, 4  ;;  %v1633_v36 = vperm.slane %v1629_v25, %v3520_v11 }
 0x2b7   : > { %1730 = vrot.lane.b32.xlu1 %v1709_v40, %s3392_s14 }
 0x2b8   : > { %v1590_v13 = vpop.permute.xlu0 %1589  ;;  %v1705_v8 = vsel %vm4460_vm14, %v1682_v24, 0.0  ;;  %v1687_v30 = vrot.slane %v1682_v24, 4  ;;  %v1690_v53 = vsel %vm248_vm0, 0.0, %v1689_v10  ;;  %v1649_v23 = vsel %vm248_vm0, %v1633_v36, %v1648_v60 }
 0x2b9   : > { %v1610_v57 = vrot.slane %v1590_v13, 4  ;;  %1722 = vrot.lane.b32.xlu0 %v1705_v8, %s3392_s14  ;;  %v1711_v33 = vsel %vm4460_vm14, %v1690_v53, 0.0  ;;  %v1657_v62 = vperm.slane %v1649_v23, %v3548_v29  ;;  %v1646_v22 = vrot.slane %v1633_v36, 4 }
 0x2ba   : > { %v1688_v63 = vsel %vm248_vm0, 0.0, %v1687_v30 }
 0x2bb   : > { %v1611_v21 = vsel %vm248_vm0, %v1610_v57, %v1583_v44  ;;  %v1707_v9 = vsel %vm4460_vm14, %v1688_v63, 0.0  ;;  %v1662_v38 = vrot.slane %v1657_v62, 4  ;;  %v1647_v58 = vsel %vm248_vm0, %v1646_v22, %v1627_v17 }
 0x2bc   : > { %1726 = vrot.lane.b32.xlu2 %v1707_v9, %s3392_s14  ;;  %v1615_v32 = vperm.slane %v1611_v21, %v3520_v11  ;;  %v1653_v4 = vperm.slane %v1647_v58, %v3548_v29  ;;  %vm1744_vm14 = vcmask 7168  }
 0x2be   : > { %v1636_v26 = vrot.slane %v1615_v32, 4  ;;  %v1658_v1 = vrot.slane %v1653_v4, 4 }
 0x2c0   : > { %v1587_v15 = vpop.permute.xlu0 %1586 }
 0x2c1   : > { %v1617_v39 = vsel %vm248_vm0, %v1616_v3, %v1587_v15  ;;  %1734 = vrot.lane.b32.xlu0 %v1711_v33, %s3392_s14 }
 0x2c2   : > { %v1621_v2 = vperm.slane %v1617_v39, %v3520_v11 }
 0x2c4   : > { %v1634_v42 = vrot.slane %v1621_v2, 4  ;;  %v1637_v37 = vsel %vm248_vm0, %v1621_v2, %v1636_v26 }
 0x2c5   : > { %v1645_v48 = vperm.slane %v1637_v37, %v3548_v29 }
 0x2c6   : > { %v1635_v59 = vsel %vm248_vm0, %v1634_v42, %v1615_v32 }
 0x2c7   : > { %v1663_v56 = vsel %vm248_vm0, %v1662_v38, %v1645_v48  ;;  %v1664_v20 = vrot.slane %v1645_v48, 4  ;;  %v1641_v44 = vperm.slane %v1635_v59, %v3548_v29 }
 0x2c8   : > { %v1708_v61 = vsel %vm4493_vm13, %v1663_v56, 0.0 }
 0x2c9   : > { %1728 = vrot.lane.b32.xlu0 %v1708_v61, %s3392_s14  ;;  %v1665_v12 = vsel %vm248_vm0, %v1657_v62, %v1664_v20  ;;  %v1660_v50 = vrot.slane %v1641_v44, 4  ;;  %v1659_v43 = vsel %vm248_vm0, %v1658_v1, %v1641_v44 }
 0x2ca   : > { %v1710_v47 = vsel %vm4493_vm13, %v1665_v12, 0.0  ;;  %v1704_v55 = vsel %vm4493_vm13, %v1659_v43, 0.0 }
 0x2cb   : > { %1732 = vrot.lane.b32.xlu2 %v1710_v47, %s3392_s14  ;;  %v1661_v19 = vsel %vm248_vm0, %v1653_v4, %v1660_v50 }
 0x2cc   : > { %v1706_v51 = vsel %vm4493_vm13, %v1661_v19, 0.0 }
 0x2cd   : > { %1724 = vrot.lane.b32.xlu1 %v1706_v51, %s3392_s14 }
 0x2d3   : > { %1720 = vrot.lane.b32.xlu2 %v1704_v55, %s3392_s14 }
 0x316   : > { %v1727_v27 = vpop.permute.xlu2 %1726 }
 0x317   : > { %v1748_v40 = vsel %vm1744_vm14, 0.0, %v1727_v27 }
 0x318   : > { %v1757_v8 = vsel %vm1753_vm15, %v1748_v40, 0.0 }
 0x319   : > { %v2384_v63 = vrot.slane %v1757_v8, 2  ;;  %v2071_v3 = vrot.slane %v1757_v8, 1 }
 0x325   : > { %v1733_v46 = vpop.permute.xlu2 %1732 }
 0x326   : > { %v1751_v6 = vsel %vm1744_vm14, 0.0, %v1733_v46 }
 0x327   : > { %v4519_v41 = vsel %vm1753_vm15, %v1751_v6, 0.0 }
 0x328   : > { %v2389_v14 = vrot.slane %v4519_v41, 2  ;;  %v2076_v22 = vrot.slane %v4519_v41, 1  ;;  %v1774_v47 = vrot.slane %v4519_v41, 4 }
 0x329   : > { %v1731_v45 = vpop.permute.xlu1 %1730 }
 0x32a   : > { %v1750_v60 = vsel %vm1744_vm14, 0.0, %v1731_v45 }
 0x32b   : > { %v1723_v31 = vpop.permute.xlu0 %1722  ;;  %v1759_v62 = vsel %vm1753_vm15, %v1750_v60, 0.0 }
 0x32c   : > { %v1746_v57 = vsel %vm1744_vm14, 0.0, %v1723_v31  ;;  %v2387_v37 = vrot.slane %v1759_v62, 2  ;;  %v2074_v12 = vrot.slane %v1759_v62, 1 }
 0x32d   : > { %v1721_v7 = vpop.permute.xlu2 %1720  ;;  %v1755_v53 = vsel %vm1753_vm15, %v1746_v57, 0.0 }
 0x32e   : > { %v1745_v18 = vsel %vm1744_vm14, 0.0, %v1721_v7  ;;  %v2381_v39 = vrot.slane %v1755_v53, 2  ;;  %v2068_v44 = vrot.slane %v1755_v53, 1 }
 0x32f   : > { %v4533_v25 = vsel %vm1753_vm15, %v1745_v18, 0.0 }
 0x330   : > { %v2380_v23 = vrot.slane %v4533_v25, 2  ;;  %v2067_v58 = vrot.slane %v4533_v25, 1  ;;  %v1764_v1 = vrot.slane %v4533_v25, 4 }
 0x332   : > { %v4560_v42 = vsel %vm1076_vm2, %v2380_v23, %v2381_v39  ;;  %v2069_v50 = vsel %vm659_vm1, %v2067_v58, %v2068_v44 }
 0x333   : > { %v1735_v34 = vpop.permute.xlu0 %1734  ;;  %v3158_v0 = vpack.i.bf16 %v4519_v41, %v4560_v42  ;;  %v3173_v7 = vpack.i.bf16 %v4533_v25, %v2069_v50 }
 0x334   : > { %v1752_v5 = vsel %vm1744_vm14, 0.0, %v1735_v34 }
 0x335   : > { %v1761_v16 = vsel %vm1753_vm15, %v1752_v5, 0.0 }
 0x336   : > { %v2390_v52 = vrot.slane %v1761_v16, 2  ;;  %v2077_v15 = vrot.slane %v1761_v16, 1 }
 0x338   : > { %v4525_v35 = vsel %vm1076_vm2, %v2389_v14, %v2390_v52  ;;  %v2078_v48 = vsel %vm659_vm1, %v2076_v22, %v2077_v15 }
 0x339   : > { %2596 = vrot.lane.b32.xlu0 %v4525_v35, %s3390_s16  ;;  %v2095_v45 = vrot.slane %v2078_v48, 4 }
 0x33b   : > { %v1729_v54 = vpop.permute.xlu0 %1728 }
 0x33c   : > { %v1749_v24 = vsel %vm1744_vm14, 0.0, %v1729_v54 }
 0x33d   : > { %v1758_v17 = vsel %vm1753_vm15, %v1749_v24, 0.0 }
 0x33e   : > { %v3133_v13 = vpack.i.bf16 %v4533_v25, %v1758_v17  ;;  %v2386_v26 = vrot.slane %v1758_v17, 2  ;;  %v2073_v20 = vrot.slane %v1758_v17, 1  ;;  %v1762_v4 = vrot.slane %v1758_v17, 4 }
 0x33f   : > { %v1725_v30 = vpop.permute.xlu1 %1724  ;;  %v1765_v46 = vsel %vm248_vm0, %v1758_v17, %v1764_v1 }
 0x340   : > { %v1747_v10 = vsel %vm1744_vm14, 0.0, %v1725_v30  ;;  %3134 = vrot.lane.b32.xlu2 %v3133_v13, %s3390_s16  ;;  %v4567_v59 = vsel %vm1076_vm2, %v2386_v26, %v2387_v37  ;;  %v2075_v51 = vsel %vm659_vm1, %v2073_v20, %v2074_v12  ;;  %v1763_v55 = vsel %vm248_vm0, %v1762_v4, %v4533_v25 }
 0x341   : > { %v1756_v36 = vsel %vm1753_vm15, %v1747_v10, 0.0  ;;  %v3148_v56 = vpack.i.bf16 %v2078_v48, %v4567_v59  ;;  %v3153_v31 = vpack.i.bf16 %v4519_v41, %v2075_v51  ;;  %v2396_v34 = vrot.slane %v4567_v59, 4 }
 0x342   : > { %v3128_v21 = vpack.i.bf16 %v1758_v17, %v1756_v36  ;;  %v2383_v9 = vrot.slane %v1756_v36, 2  ;;  %v2070_v49 = vrot.slane %v1756_v36, 1  ;;  %v1776_v61 = vrot.slane %v1756_v36, 4 }
 0x343   : > { %v3168_v19 = vpack.i.bf16 %v1756_v36, %v2069_v50  ;;  %v1775_v27 = vsel %vm248_vm0, %v1774_v47, %v1756_v36  ;;  %v1769_v5 = vperm.slane %v1763_v55, %v3520_v11  ;;  %v2083_v52 = vrot.slane %v2075_v51, 4 }
 0x344   : > { %3129 = vrot.lane.b32.xlu1 %v3128_v21, %s3382_s27  ;;  %v4547_v32 = vsel %vm1076_vm2, %v2383_v9, %v2384_v63  ;;  %v4556_v2 = vsel %vm659_vm1, %v2070_v49, %v2071_v3  ;;  %v1777_v43 = vsel %vm248_vm0, %v4519_v41, %v1776_v61  ;;  %v1781_v16 = vperm.slane %v1775_v27, %v3520_v11 }
 0x345   : > { %2592 = vrot.lane.b32.xlu0 %v4547_v32, %s3390_s16  ;;  %v3138_v33 = vpack.i.bf16 %v4547_v32, %v4525_v35  ;;  %v3143_v38 = vpack.i.bf16 %v4556_v2, %v2078_v48  ;;  %v1785_v6 = vperm.slane %v1777_v43, %v3520_v11  ;;  %v1773_v14 = vperm.slane %v1765_v46, %v3520_v11 }
 0x346   : > { %v2408_v41 = vrot.slane %v4525_v35, 4  ;;  %v2397_v54 = vsel %vm248_vm0, %v2396_v34, %v4560_v42  ;;  %v1788_v40 = vrot.slane %v1769_v5, 4  ;;  %v1786_v24 = vrot.slane %v1781_v16, 4 }
 0x347   : > { %v1798_v18 = vrot.slane %v1785_v6, 4  ;;  %v2410_v17 = vrot.slane %v4547_v32, 4  ;;  %v2097_v13 = vrot.slane %v4556_v2, 4  ;;  %v2084_v8 = vsel %vm248_vm0, %v2083_v52, %v2069_v50 }
 0x348   : > { %3139 = vrot.lane.b32.xlu2 %v3138_v33, %s3382_s27  ;;  %v1800_v25 = vrot.slane %v1773_v14, 4  ;;  %v3163_v30 = vpack.i.bf16 %v2075_v51, %v4556_v2  ;;  %v2409_v57 = vsel %vm248_vm0, %v2408_v41, %v4547_v32  ;;  %v2096_v10 = vsel %vm248_vm0, %v2095_v45, %v4556_v2 }
 0x349   : > { %v1799_v36 = vsel %vm248_vm0, %v1798_v18, %v1773_v14  ;;  %v1789_v21 = vsel %vm248_vm0, %v1781_v16, %v1788_v40  ;;  %v1787_v9 = vsel %vm248_vm0, %v1786_v24, %v1769_v5  ;;  %v4615_v60 = vperm.slane %v2084_v8, %v3520_v11 }
 0x34a   : > { %v1801_v63 = vsel %vm248_vm0, %v1785_v6, %v1800_v25  ;;  %v4618_v53 = vperm.slane %v2397_v54, %v3520_v11  ;;  %v2411_v49 = vsel %vm248_vm0, %v4525_v35, %v2410_v17  ;;  %v2098_v23 = vsel %vm248_vm0, %v2078_v48, %v2097_v13 }
 0x34b   : > { %v4624_v32 = vperm.slane %v2409_v57, %v3520_v11  ;;  %v1805_v3 = vperm.slane %v1799_v36, %v3548_v29  ;;  %v4628_v15 = vperm.slane %v2096_v10, %v3520_v11  ;;  %v1809_v33 = vperm.slane %v1801_v63, %v3548_v29 }
 0x34c   : > { %3144 = vrot.lane.b32.xlu1 %v3143_v38, %s3390_s16  ;;  %v1797_v62 = vperm.slane %v1789_v21, %v3548_v29  ;;  %v4633_v39 = vperm.slane %v1787_v9, %v3548_v29  ;;  %v2419_v22 = vperm.slane %v2411_v49, %v3520_v11  ;;  %v2106_v35 = vperm.slane %v2098_v23, %v3520_v11 }
 0x34d   : > { %3159 = vrot.lane.b32.xlu0 %v3158_v0, %s3382_s27  ;;  %v2109_v26 = vrot.slane %v4615_v60, 4  ;;  %v2422_v2 = vrot.slane %v4618_v53, 4  ;;  %v2398_v37 = vrot.slane %v4560_v42, 4  ;;  %v2085_v48 = vrot.slane %v2069_v50, 4 }
 0x34e   : > { %v1810_v58 = vrot.slane %v4633_v39, 4  ;;  %v2119_v20 = vrot.slane %v2106_v35, 4  ;;  %v2432_v44 = vrot.slane %v2419_v22, 4  ;;  %v1814_v12 = vrot.slane %v1805_v3, 4 }
 0x34f   : > { %v2399_v38 = vsel %vm248_vm0, %v4567_v59, %v2398_v37  ;;  %v2086_v0 = vsel %vm248_vm0, %v2075_v51, %v2085_v48  ;;  %v2110_v61 = vsel %vm248_vm0, %v4628_v15, %v2109_v26  ;;  %v1816_v27 = vrot.slane %v1809_v33, 4 }
 0x350   : > { %3149 = vrot.lane.b32.xlu2 %v3148_v56, %s3382_s27  ;;  %v1812_v56 = vrot.slane %v1797_v62, 4  ;;  %v2094_v4 = vperm.slane %v2086_v0, %v3520_v11  ;;  %v1811_v50 = vsel %vm248_vm0, 0.0, %v1810_v58  ;;  %v2118_v47 = vperm.slane %v2110_v61, %v3548_v29 }
 0x351   : > { %v1815_v55 = vsel %vm248_vm0, 0.0, %v1814_v12  ;;  %v1817_v5 = vsel %vm248_vm0, 0.0, %v1816_v27  ;;  %v2420_v40 = vrot.slane %v4624_v32, 4  ;;  %v2107_v13 = vrot.slane %v4628_v15, 4 }
 0x352   : > { %v1813_v51 = vsel %vm248_vm0, 0.0, %v1812_v56  ;;  %v2120_v1 = vsel %vm248_vm0, %v2119_v20, %v2094_v4  ;;  %v2133_v6 = vrot.slane %v2118_v47, 4 }
 0x353   : > { %v2108_v36 = vsel %vm248_vm0, %v2107_v13, %v4615_v60  ;;  %v2421_v63 = vsel %vm248_vm0, %v2420_v40, %v4618_v53 }
 0x354   : > { %2594 = vrot.lane.b32.xlu1 %v4567_v59, %s3390_s16  ;;  %v2407_v59 = vperm.slane %v2399_v38, %v3520_v11  ;;  %v2134_v52 = vsel %vm248_vm0, 0.0, %v2133_v6  ;;  %v4685_v23 = vperm.slane %v2108_v36, %v3548_v29 }
 0x355   : > { %3169 = vrot.lane.b32.xlu0 %v3168_v19, %s3390_s16 }
 0x356   : > { %v2433_v43 = vsel %vm248_vm0, %v2432_v44, %v2407_v59  ;;  %v2434_v18 = vrot.slane %v2407_v59, 4  ;;  %v2131_v60 = vrot.slane %v4685_v23, 4 }
 0x357   : > { %v2439_v46 = vperm.slane %v2433_v43, %v3548_v29 }
 0x358   : > { %3154 = vrot.lane.b32.xlu2 %v3153_v31, %s3390_s16  ;;  %v2126_v31 = vperm.slane %v2120_v1, %v3548_v29  ;;  %v2435_v17 = vsel %vm248_vm0, %v2419_v22, %v2434_v18  ;;  %v2132_v22 = vsel %vm248_vm0, 0.0, %v2131_v60 }
 0x359   : > { %v2448_v54 = vrot.slane %v2439_v46, 4  ;;  %v2443_v10 = vperm.slane %v2435_v17, %v3548_v29 }
 0x35a   : > { %v3183_v16 = vpack.i.bf16 %v2126_v31, %v2439_v46  ;;  %v2135_v41 = vrot.slane %v2126_v31, 4 }
 0x35b   : > { %v2450_v49 = vrot.slane %v2443_v10, 4 }
 0x35c   : > { %2590 = vrot.lane.b32.xlu1 %v4560_v42, %s3390_s16  ;;  %v2423_v42 = vsel %vm248_vm0, %v4624_v32, %v2422_v2  ;;  %v2136_v25 = vsel %vm248_vm0, 0.0, %v2135_v41  ;;  %v4688_v32 = vperm.slane %v2421_v63, %v3548_v29 }
 0x35d   : > { %3174 = vrot.lane.b32.xlu0 %v3173_v7, %s3382_s27  ;;  %v2431_v19 = vperm.slane %v2423_v42, %v3548_v29  ;;  %v2121_v7 = vrot.slane %v2094_v4, 4 }
 0x35e   : > { %v2444_v53 = vrot.slane %v4688_v32, 4 }
 0x35f   : > { %v2446_v34 = vrot.slane %v2431_v19, 4  ;;  %v2122_v24 = vsel %vm248_vm0, %v2106_v35, %v2121_v7  ;;  %v3178_v8 = vpack.i.bf16 %v2118_v47, %v2431_v19 }
 0x360   : > { %3164 = vrot.lane.b32.xlu2 %v3163_v30, %s3382_s27  ;;  %v2449_v30 = vsel %vm248_vm0, 0.0, %v2448_v54  ;;  %v2130_v57 = vperm.slane %v2122_v24, %v3548_v29  ;;  %v2445_v35 = vsel %vm248_vm0, 0.0, %v2444_v53 }
 0x361   : > { %v2447_v14 = vsel %vm248_vm0, 0.0, %v2446_v34  ;;  %v3203_v21 = vpack.i.bf16 %v2136_v25, %v2449_v30  ;;  %v3193_v26 = vpack.i.bf16 %v2132_v22, %v2445_v35 }
 0x362   : > { %v3198_v45 = vpack.i.bf16 %v2134_v52, %v2447_v14  ;;  %v2137_v9 = vrot.slane %v2130_v57, 4 }
 0x364   : > { %1831 = vrot.lane.b32.xlu1 %v1805_v3, %s3383_s30  ;;  %v3188_v3 = vpack.i.bf16 %v2130_v57, %v2443_v10  ;;  %v2138_v15 = vsel %vm248_vm0, 0.0, %v2137_v9 }
 0x365   : > { %1839 = vrot.lane.b32.xlu0 %v1809_v33, %s3385_s9  ;;  %v2451_v33 = vsel %vm248_vm0, 0.0, %v2450_v49 }
 0x368   : > { %1823 = vrot.lane.b32.xlu2 %v1797_v62, %s3384_s8  ;;  %v3208_v62 = vpack.i.bf16 %v2138_v15, %v2451_v33 }
 0x36c   : > { %1819 = vrot.lane.b32.xlu1 %v1811_v50, %s3387_s12 }
 0x36d   : > { %1827 = vrot.lane.b32.xlu0 %v1813_v51, %s3386_s10 }
 0x370   : > { %1835 = vrot.lane.b32.xlu2 %v1815_v55, %s3388_s13 }
 0x374   : > { %1843 = vrot.lane.b32.xlu1 %v1817_v5, %s3389_s15 }
 0x375   : > { %3184 = vrot.lane.b32.xlu0 %v3183_v16, %s3383_s30 }
 0x378   : > { %3199 = vrot.lane.b32.xlu2 %v3198_v45, %s3386_s10 }
 0x37c   : > { %3179 = vrot.lane.b32.xlu1 %v3178_v8, %s3384_s8 }
 0x380   : > { %3204 = vrot.lane.b32.xlu2 %v3203_v21, %s3388_s13 }
 0x384   : > { %3189 = vrot.lane.b32.xlu1 %v3188_v3, %s3385_s9 }
 0x388   : > { %3209 = vrot.lane.b32.xlu2 %v3208_v62, %s3389_s15 }
 0x38c   : > { %3194 = vrot.lane.b32.xlu1 %v3193_v26, %s3387_s12 }
 0x39a   : > { %v3135_v2 = vpop.permute.xlu2 %3134 }
 0x39b   : > { %v3136_v58 = vunpack.i.l.bf16 %v3135_v2  ;;  %v3137_v44 = vunpack.i.h.bf16 %v3135_v2 }
 0x39d   : > { %v1972_v61 = vrot.slane %v3136_v58, 4  ;;  %v1974_v4 = vrot.slane %v3137_v44, 4 }
 0x39f   : > { %v1973_v50 = vsel %vm248_vm0, %v1972_v61, %v3137_v44  ;;  %v1975_v43 = vsel %vm248_vm0, %v3136_v58, %v1974_v4 }
 0x3a0   : > { %v4712_v55 = vperm.slane %v1973_v50, %v3520_v11  ;;  %v4722_v52 = vperm.slane %v1975_v43, %v3520_v11 }
 0x3a2   : > { %v3140_v37 = vpop.permute.xlu2 %3139  ;;  %v1998_v7 = vrot.slane %v4712_v55, 4 }
 0x3a3   : > { %v3142_v56 = vunpack.i.h.bf16 %v3140_v37  ;;  %v3141_v12 = vunpack.i.l.bf16 %v3140_v37 }
 0x3a5   : > { %v2513_v42 = vrot.slane %v3142_v56, 4  ;;  %v2511_v47 = vrot.slane %v3141_v12, 4 }
 0x3a7   : > { %v2514_v19 = vsel %vm248_vm0, %v3141_v12, %v2513_v42  ;;  %v2512_v46 = vsel %vm248_vm0, %v2511_v47, %v3142_v56 }
 0x3a8   : > { %v4715_v27 = vperm.slane %v2514_v19, %v3520_v11  ;;  %v4727_v18 = vperm.slane %v2512_v46, %v3520_v11 }
 0x3aa   : > { %v4700_v38 = vpop.permute.xlu2 %3149  ;;  %v2535_v41 = vrot.slane %v4715_v27, 4 }
 0x3ab   : > { %v2597_v48 = vpop.permute.xlu0 %2596  ;;  %v3151_v31 = vunpack.i.l.bf16 %v4700_v38  ;;  %v3152_v6 = vunpack.i.h.bf16 %v4700_v38 }
 0x3ac   : > { %v2614_v17 = vrot.slane %v2597_v48, 4 }
 0x3ad   : > { %v2499_v54 = vrot.slane %v3151_v31, 4  ;;  %v2198_v24 = vrot.slane %v3152_v6, 4 }
 0x3b2   : > { %v3155_v1 = vpop.permute.xlu2 %3154 }
 0x3b3   : > { %v3157_v34 = vunpack.i.h.bf16 %v3155_v1  ;;  %v3156_v5 = vunpack.i.l.bf16 %v3155_v1 }
 0x3b5   : > { %v1984_v13 = vrot.slane %v3157_v34, 4  ;;  %v2289_v8 = vrot.slane %v3156_v5, 4 }
 0x3b6   : > { %v4702_v0 = vpop.permute.xlu1 %3129 }
 0x3b7   : > { %v2593_v20 = vpop.permute.xlu0 %2592  ;;  %v3132_v30 = vunpack.i.h.bf16 %v4702_v0  ;;  %v3131_v53 = vunpack.i.l.bf16 %v4702_v0 }
 0x3b8   : > { %v2616_v14 = vrot.slane %v2593_v20, 4  ;;  %v4740_v62 = vsel %vm248_vm0, %v2614_v17, %v2593_v20 }
 0x3b9   : > { %v1869_v2 = vrot.slane %v3132_v30, 4 }
 0x3ba   : > { %v2617_v63 = vsel %vm248_vm0, %v2597_v48, %v2616_v14  ;;  %v4742_v22 = vpop.permute.xlu2 %3164 }
 0x3bb   : > { %v4753_v37 = vperm.slane %v2617_v63, %v3520_v11  ;;  %v3167_v42 = vunpack.i.h.bf16 %v4742_v22 }
 0x3be   : > { %v4704_v59 = vpop.permute.xlu1 %3144 }
 0x3bf   : > { %v4708_v51 = vpop.permute.xlu0 %3159  ;;  %v3146_v45 = vunpack.i.l.bf16 %v4704_v59  ;;  %v3147_v21 = vunpack.i.h.bf16 %v4704_v59 }
 0x3c0   : > { %v3161_v16 = vunpack.i.l.bf16 %v4708_v51 }
 0x3c1   : > { %v2301_v9 = vrot.slane %v3146_v45, 4  ;;  %v2303_v56 = vrot.slane %v3147_v21, 4 }
 0x3c2   : > { %v2500_v57 = vsel %vm248_vm0, %v2499_v54, %v3161_v16  ;;  %v2501_v49 = vrot.slane %v3161_v16, 4 }
 0x3c3   : > { %v4745_v35 = vperm.slane %v2500_v57, %v3520_v11  ;;  %v2302_v12 = vsel %vm248_vm0, %v2301_v9, %v3147_v21  ;;  %v2304_v14 = vsel %vm248_vm0, %v3146_v45, %v2303_v56  ;;  %v2186_v45 = vrot.slane %v3167_v42, 4 }
 0x3c4   : > { %v2502_v4 = vsel %vm248_vm0, %v3151_v31, %v2501_v49  ;;  %v2312_v63 = vperm.slane %v2304_v14, %v3520_v11  ;;  %v3162_v21 = vunpack.i.h.bf16 %v4708_v51 }
 0x3c5   : > { %v2525_v47 = vrot.slane %v4745_v35, 4 }
 0x3c6   : > { %v2595_v40 = vpop.permute.xlu1 %2594 }
 0x3c7   : > { %v3170_v25 = vpop.permute.xlu0 %3169  ;;  %v2602_v20 = vrot.slane %v2595_v40, 4 }
 0x3c8   : > { %v3172_v10 = vunpack.i.h.bf16 %v3170_v25  ;;  %v3171_v36 = vunpack.i.l.bf16 %v3170_v25 }
 0x3ca   : > { %v1985_v3 = vsel %vm248_vm0, %v1984_v13, %v3172_v10  ;;  %v1986_v15 = vrot.slane %v3172_v10, 4  ;;  %v2290_v33 = vsel %vm248_vm0, %v2289_v8, %v3171_v36  ;;  %v2291_v60 = vrot.slane %v3171_v36, 4 }
 0x3cb   : > { %v4748_v26 = vperm.slane %v1985_v3, %v3520_v11  ;;  %v4757_v58 = vperm.slane %v2290_v33, %v3520_v11  ;;  %v2638_v13 = vrot.slane %v4753_v37, 4  ;;  %v4786_v8 = vperm.slane %v2302_v12, %v3520_v11 }
 0x3cc   : > { %v1987_v48 = vsel %vm248_vm0, %v3157_v34, %v1986_v15  ;;  %v2292_v61 = vsel %vm248_vm0, %v3156_v5, %v2291_v60  ;;  %v1883_v34 = vrot.slane %v3131_v53, 4  ;;  %v3166_v5 = vunpack.i.l.bf16 %v4742_v22 }
 0x3cd   : > { %v4760_v44 = vperm.slane %v1987_v48, %v3520_v11  ;;  %v1999_v50 = vsel %vm248_vm0, %v4748_v26, %v1998_v7  ;;  %v2300_v31 = vperm.slane %v2292_v61, %v3520_v11  ;;  %v2315_v16 = vrot.slane %v4757_v58, 4 }
 0x3ce   : > { %v2591_v59 = vpop.permute.xlu1 %2590  ;;  %v4771_v46 = vperm.slane %v1999_v50, %v3548_v29  ;;  %v2510_v7 = vperm.slane %v2502_v4, %v3520_v11  ;;  %v2526_v36 = vsel %vm248_vm0, %v4727_v18, %v2525_v47  ;;  %v2199_v3 = vsel %vm248_vm0, %v2198_v24, %v3166_v5 }
 0x3cf   : > { %v2603_v19 = vsel %vm248_vm0, %v2602_v20, %v2591_v59  ;;  %v2604_v1 = vrot.slane %v2591_v59, 4  ;;  %v3175_v43 = vpop.permute.xlu0 %3174  ;;  %v2008_v17 = vrot.slane %v4760_v44, 4  ;;  %v2327_v9 = vrot.slane %v2300_v31, 4 }
 0x3d0   : > { %2033 = vrot.lane.b32.xlu2 %v4771_v46, %s3384_s8  ;;  %v4789_v25 = vperm.slane %v2603_v19, %v3520_v11  ;;  %v3176_v10 = vunpack.i.l.bf16 %v3175_v43  ;;  %v2316_v49 = vsel %vm248_vm0, %v4786_v8, %v2315_v16  ;;  %v2200_v15 = vrot.slane %v3166_v5, 4 }
 0x3d1   : > { %v2605_v54 = vsel %vm248_vm0, %v2595_v40, %v2604_v1  ;;  %v3177_v40 = vunpack.i.h.bf16 %v3175_v43  ;;  %v2537_v33 = vrot.slane %v2510_v7, 4  ;;  %v2009_v60 = vsel %vm248_vm0, %v2008_v17, %v4722_v52  ;;  %v1824_v1 = vpop.permute.xlu2 %1823 }
 0x3d2   : > { %v4792_v57 = vperm.slane %v2605_v54, %v3520_v11  ;;  %v2628_v48 = vrot.slane %v4789_v25, 4  ;;  %v4807_v56 = vperm.slane %v2009_v60, %v3548_v29  ;;  %v4812_v61 = vperm.slane %v2526_v36, %v3548_v29 }
 0x3d3   : > { %v1870_v12 = vsel %vm248_vm0, %v1869_v2, %v3177_v40  ;;  %v2187_v24 = vsel %vm248_vm0, %v2186_v45, %v3176_v10  ;;  %v4820_v50 = vperm.slane %v2316_v49, %v3548_v29  ;;  %v2325_v47 = vrot.slane %v2312_v63, 4 }
 0x3d4   : > { %v2639_v51 = vsel %vm248_vm0, %v2638_v13, %v4792_v57  ;;  %v1881_v19 = vrot.slane %v3162_v21, 4  ;;  %v1996_v43 = vrot.slane %v4748_v26, 4  ;;  %2041 = vrot.lane.b32.xlu0 %v4807_v56, %s3383_s30  ;;  %v2328_v5 = vsel %vm248_vm0, %v2312_v63, %v2327_v9 }
 0x3d5   : > { %v4817_v4 = vperm.slane %v2639_v51, %v3548_v29  ;;  %v4828_v2 = vperm.slane %v4740_v62, %v3520_v11  ;;  %v1871_v16 = vrot.slane %v3177_v40, 4  ;;  %v2188_v14 = vrot.slane %v3176_v10, 4 }
 0x3d6   : > { %v1832_v20 = vpop.permute.xlu1 %1831  ;;  %v3213_v54 = vpack.i.bf16 %v4820_v50, %v4812_v61  ;;  %v4835_v17 = vperm.slane %v1870_v12, %v3520_v11  ;;  %v4838_v26 = vperm.slane %v2187_v24, %v3520_v11  ;;  %v2538_v13 = vsel %vm248_vm0, %v4715_v27, %v2537_v33 }
 0x3d7   : > { %v1840_v59 = vpop.permute.xlu0 %1839  ;;  %2671 = vrot.lane.b32.xlu1 %v4817_v4, %s3383_s30  ;;  %v2326_v62 = vsel %vm248_vm0, %v2325_v47, %v2300_v31  ;;  %v4844_v45 = vperm.slane %v2199_v3, %v3520_v11  ;;  %v2629_v40 = vsel %vm248_vm0, %v4828_v2, %v2628_v48  ;;  %v4850_v10 = vperm.slane %v2328_v5, %v3548_v29 }
 0x3d8   : > { %3214 = vrot.lane.b32.xlu2 %v3213_v54, %s3384_s8  ;;  %v2536_v36 = vsel %vm248_vm0, %v2535_v41, %v2510_v7  ;;  %v2201_v63 = vsel %vm248_vm0, %v3152_v6, %v2200_v15  ;;  %v1882_v31 = vsel %vm248_vm0, %v1881_v19, %v3131_v53  ;;  %v1884_v9 = vsel %vm248_vm0, %v3162_v21, %v1883_v34 }
 0x3d9   : > { %v1997_v49 = vsel %vm248_vm0, %v1996_v43, %v4712_v55  ;;  %v1872_v3 = vsel %vm248_vm0, %v3132_v30, %v1871_v16  ;;  %v2189_v27 = vsel %vm248_vm0, %v3167_v42, %v2188_v14  ;;  %v4871_v38 = vperm.slane %v2538_v13, %v3548_v29  ;;  %v1836_v24 = vpop.permute.xlu2 %1835 }
 0x3da   : > { %v4874_v6 = vperm.slane %v2326_v62, %v3548_v29  ;;  %v1895_v41 = vrot.slane %v4835_v17, 4  ;;  %v2212_v53 = vrot.slane %v4838_v26, 4  ;;  %v4879_v55 = vperm.slane %v2629_v40, %v3548_v29 }
 0x3db   : > { %v4882_v30 = vperm.slane %v2536_v36, %v3548_v29  ;;  %v2640_v22 = vrot.slane %v4792_v57, 4  ;;  %v3228_v7 = vpack.i.bf16 %v4850_v10, %v4871_v38  ;;  %v4890_v21 = vperm.slane %v1997_v49, %v3548_v29 }
 0x3dc   : > { %v1888_v15 = vperm.slane %v1882_v31, %v3520_v11  ;;  %v1880_v33 = vperm.slane %v1872_v3, %v3520_v11  ;;  %v2197_v60 = vperm.slane %v2189_v27, %v3520_v11  ;;  %2663 = vrot.lane.b32.xlu0 %v4879_v55, %s3384_s8  ;;  %v1892_v48 = vperm.slane %v1884_v9, %v3520_v11 }
 0x3dd   : > { %v3218_v12 = vpack.i.bf16 %v4874_v6, %v4882_v30  ;;  %v2213_v43 = vsel %vm248_vm0, %v4844_v45, %v2212_v53  ;;  %v2641_v5 = vsel %vm248_vm0, %v4753_v37, %v2640_v22  ;;  %v2313_v36 = vrot.slane %v4786_v8, 4 }
 0x3de   : > { %v1820_v0 = vpop.permute.xlu1 %1819  ;;  %v1896_v19 = vsel %vm248_vm0, %v1888_v15, %v1895_v41  ;;  %v1907_v16 = vrot.slane %v1880_v33, 4  ;;  %v2224_v14 = vrot.slane %v2197_v60, 4  ;;  %v4918_v40 = vperm.slane %v2213_v43, %v3548_v29 }
 0x3df   : > { %v1846_v42 = vsel %vm356_vm3, %v4633_v39, %v1820_v0  ;;  %v1828_v34 = vpop.permute.xlu0 %1827  ;;  %v2209_v39 = vperm.slane %v2201_v63, %v3520_v11  ;;  %3229 = vrot.lane.b32.xlu1 %v3228_v7, %s3385_s9  ;;  %v4915_v62 = vperm.slane %v1896_v19, %v3548_v29  ;;  %v4922_v31 = vperm.slane %v2641_v5, %v3548_v29 }
 0x3e0   : > { %v1847_v57 = vsel %vm358_vm4, %v1846_v42, %v1824_v1  ;;  %3219 = vrot.lane.b32.xlu2 %v3218_v12, %s3383_s30  ;;  %v2020_v1 = vrot.slane %v4890_v21, 4  ;;  %v1908_v3 = vsel %vm248_vm0, %v1892_v48, %v1907_v16  ;;  %v2523_v8 = vrot.slane %v4727_v18, 4 }
 0x3e1   : > { %v1848_v51 = vsel %vm360_vm5, %v1847_v57, %v1828_v34  ;;  %v2222_v13 = vrot.slane %v2209_v39, 4  ;;  %v2225_v27 = vsel %vm248_vm0, %v2209_v39, %v2224_v14  ;;  %v3223_v41 = vpack.i.bf16 %v4915_v62, %v4918_v40 }
 0x3e2   : > { %v1849_v47 = vsel %vm362_vm6, %v1848_v51, %v1832_v20  ;;  %v1905_v20 = vrot.slane %v1892_v48, 4  ;;  %v2021_v37 = vsel %vm248_vm0, 0.0, %v2020_v1  ;;  %v2314_v53 = vsel %vm248_vm0, %v2313_v36, %v4757_v58 }
 0x3e3   : > { %v1850_v11 = vsel %vm364_vm7, %v1849_v47, %v1836_v24  ;;  %v2223_v49 = vsel %vm248_vm0, %v2222_v13, %v2197_v60  ;;  %v4948_v42 = vperm.slane %v1908_v3, %v3548_v29  ;;  %v4951_v18 = vperm.slane %v2225_v27, %v3548_v29 }
 0x3e4   : > { %v1851_v54 = vsel %vm366_vm8, %v1850_v11, %v1840_v59  ;;  %v1906_v59 = vsel %vm248_vm0, %v1905_v20, %v1880_v33  ;;  %2029 = vrot.lane.b32.xlu0 %v2021_v37, %s3387_s12  ;;  %v4944_v22 = vperm.slane %v2223_v49, %v3548_v29  ;;  %v2524_v34 = vsel %vm248_vm0, %v2523_v8, %v4745_v35  ;;  %v3200_v37 = vpop.permute.xlu2 %3199 }
 0x3e5   : > { %v4941_v0 = vperm.slane %v1906_v59, %v3548_v29  ;;  %v4956_v7 = vperm.slane %v2314_v53, %v3548_v29  ;;  %v2024_v60 = vrot.slane %v4807_v56, 4  ;;  %v4962_v57 = vperm.slane %v2524_v34, %v3548_v29 }
 0x3e6   : > { %v1844_v63 = vpop.permute.xlu1 %1843  ;;  %v2210_v39 = vrot.slane %v4844_v45, 4  ;;  %v1893_v48 = vrot.slane %v1888_v15, 4  ;;  %v3238_v51 = vpack.i.bf16 %v4948_v42, %v4951_v18  ;;  %v2626_v24 = vrot.slane %v4828_v2, 4 }
 0x3e7   : > { %v4926_v9 = vsel %vm368_vm9, %v1851_v54, %v1844_v63  ;;  %2679 = vrot.lane.b32.xlu1 %v4922_v31, %s3385_s9  ;;  %v3233_v58 = vpack.i.bf16 %v4941_v0, %v4944_v22  ;;  %v2337_v35 = vrot.slane %v4956_v7, 4  ;;  %v2025_v45 = vsel %vm248_vm0, 0.0, %v2024_v60 }
 0x3e8   : > { %3224 = vrot.lane.b32.xlu2 %v3223_v41, %s3384_s8  ;;  %v1894_v12 = vsel %vm248_vm0, %v1893_v48, %v4835_v17  ;;  %v2211_v56 = vsel %vm248_vm0, %v2210_v39, %v4838_v26  ;;  %v2547_v15 = vrot.slane %v4962_v57, 4  ;;  %v2339_v47 = vrot.slane %v4820_v50, 4 }
 0x3e9   : > { %v2022_v19 = vrot.slane %v4771_v46, 4  ;;  %v2549_v43 = vrot.slane %v4812_v61, 4  ;;  %v2338_v1 = vsel %vm248_vm0, 0.0, %v2337_v35  ;;  %v2627_v17 = vsel %vm248_vm0, %v2626_v24, %v4789_v25 }
 0x3ea   : > { %v4985_v26 = vperm.slane %v1894_v12, %v3548_v29  ;;  %v4988_v2 = vperm.slane %v2211_v56, %v3548_v29  ;;  %v2548_v50 = vsel %vm248_vm0, 0.0, %v2547_v15  ;;  %v2340_v5 = vsel %vm248_vm0, 0.0, %v2339_v47 }
 0x3eb   : > { %v2023_v46 = vsel %vm248_vm0, 0.0, %v2022_v19  ;;  %v3243_v61 = vpack.i.bf16 %v2338_v1, %v2548_v50  ;;  %v4996_v16 = vperm.slane %v2627_v17, %v3548_v29  ;;  %v2550_v25 = vsel %vm248_vm0, 0.0, %v2549_v43 }
 0x3ec   : > { %3234 = vrot.lane.b32.xlu0 %v3233_v58, %s3383_s30  ;;  %v1917_v14 = vrot.slane %v4985_v26, 4  ;;  %v2234_v54 = vrot.slane %v4988_v2, 4  ;;  %v3248_v13 = vpack.i.bf16 %v2340_v5, %v2550_v25  ;;  %v2654_v49 = vrot.slane %v4817_v4, 4 }
 0x3ed   : > { %v2650_v20 = vrot.slane %v4996_v16, 4  ;;  %v2236_v53 = vrot.slane %v4918_v40, 4  ;;  %v1919_v34 = vrot.slane %v4915_v62, 4  ;;  %v3202_v39 = vunpack.i.h.bf16 %v3200_v37 }
 0x3ee   : > { %v3180_v33 = vpop.permute.xlu1 %3179  ;;  %v1918_v36 = vsel %vm248_vm0, 0.0, %v1917_v14  ;;  %v2235_v63 = vsel %vm248_vm0, 0.0, %v2234_v54  ;;  %v3201_v48 = vunpack.i.l.bf16 %v3200_v37  ;;  %v2655_v62 = vsel %vm248_vm0, 0.0, %v2654_v49 }
 0x3ef   : > { %3239 = vrot.lane.b32.xlu1 %v3238_v51, %s3385_s9  ;;  %v2651_v3 = vsel %vm248_vm0, 0.0, %v2650_v20  ;;  %v3253_v41 = vpack.i.bf16 %v1918_v36, %v2235_v63  ;;  %v3182_v58 = vunpack.i.h.bf16 %v3180_v33  ;;  %v3181_v60 = vunpack.i.l.bf16 %v3180_v33  ;;  %v3205_v63 = vpop.permute.xlu2 %3204 }
 0x3f0   : > { %2045 = vrot.lane.b32.xlu2 %v2025_v45, %s3388_s13  ;;  %v2652_v56 = vrot.slane %v4879_v55, 4  ;;  %v2010_v24 = vrot.slane %v4722_v52, 4  ;;  %v2656_v45 = vrot.slane %v4922_v31, 4  ;;  %v2341_v15 = vrot.slane %v4874_v6, 4 }
 0x3f1   : > { %v2238_v1 = vrot.slane %v4944_v22, 4  ;;  %v1921_v55 = vrot.slane %v4941_v0, 4  ;;  %v2551_v17 = vrot.slane %v4882_v30, 4  ;;  %v2343_v30 = vrot.slane %v4850_v10, 4 }
 0x3f2   : > { %v2653_v47 = vsel %vm248_vm0, 0.0, %v2652_v56  ;;  %v2011_v43 = vsel %vm248_vm0, %v4760_v44, %v2010_v24  ;;  %v2657_v52 = vsel %vm248_vm0, 0.0, %v2656_v45  ;;  %v2342_v31 = vsel %vm248_vm0, 0.0, %v2341_v15 }
 0x3f3   : > { %v2019_v6 = vperm.slane %v2011_v43, %v3548_v29  ;;  %v1922_v44 = vsel %vm248_vm0, 0.0, %v1921_v55  ;;  %v2239_v22 = vsel %vm248_vm0, 0.0, %v2238_v1  ;;  %v2552_v0 = vsel %vm248_vm0, 0.0, %v2551_v17 }
 0x3f4   : > { %2037 = vrot.lane.b32.xlu0 %v2023_v46, %s3386_s10  ;;  %v3258_v50 = vpack.i.bf16 %v2342_v31, %v2552_v0  ;;  %v3273_v46 = vpack.i.bf16 %v1922_v44, %v2239_v22  ;;  %v2344_v25 = vsel %vm248_vm0, 0.0, %v2343_v30  ;;  %v1923_v10 = vrot.slane %v4948_v42, 4  ;;  %v2710_v30 = vld [vmem:[%s5209_s4] sm:$0xf] }
 0x3f5   : > { %v2026_v5 = vrot.slane %v2019_v6, 4  ;;  %v3206_v42 = vunpack.i.l.bf16 %v3205_v63 }
 0x3f6   : > { %v4990_v11 = vpop.permute.xlu1 %3189 }
 0x3f7   : > { %3244 = vrot.lane.b32.xlu1 %v3243_v61, %s3387_s12  ;;  %v2553_v61 = vrot.slane %v4871_v38, 4  ;;  %v2027_v29 = vsel %vm248_vm0, 0.0, %v2026_v5  ;;  %v1924_v38 = vsel %vm248_vm0, 0.0, %v1923_v10  ;;  %v5059_v37 = vpop.permute.xlu2 %3209 }
 0x3f8   : > { %3249 = vrot.lane.b32.xlu2 %v3248_v13, %s3386_s10  ;;  %v2240_v13 = vrot.slane %v4951_v18, 4 }
 0x3f9   : > { %v2554_v14 = vsel %vm248_vm0, 0.0, %v2553_v61 }
 0x3fa   : > { %v3268_v54 = vpack.i.bf16 %v2344_v25, %v2554_v14  ;;  %v2241_v20 = vsel %vm248_vm0, 0.0, %v2240_v13 }
 0x3fb   : > { %v3278_v36 = vpack.i.bf16 %v1924_v38, %v2241_v20 }
 0x3fc   : > { %2659 = vrot.lane.b32.xlu0 %v2651_v3, %s3387_s12 }
 0x3fe   : > { %v3195_v59 = vpop.permute.xlu1 %3194 }
 0x3ff   : > { %v3197_v27 = vunpack.i.h.bf16 %v3195_v59  ;;  %v3196_v8 = vunpack.i.l.bf16 %v3195_v59  ;;  %3254 = vrot.lane.b32.xlu1 %v3253_v41, %s3387_s12  ;;  %v3185_v59 = vpop.permute.xlu0 %3184  ;;  %v3191_v41 = vunpack.i.l.bf16 %v4990_v11  ;;  %s229_s12 = sand.u32 1, %s3354_s19  }
 0x400   : > { %2675 = vrot.lane.b32.xlu2 %v2655_v62, %s3388_s13  ;;  %v3187_v49 = vunpack.i.h.bf16 %v3185_v59  ;;  %v3186_v3 = vunpack.i.l.bf16 %v3185_v59 }
 0x401   : > { %v2167_v51 = vsel %vm356_vm3, %v4685_v23, %v3197_v27  ;;  %v2480_v4 = vsel %vm356_vm3, %v4688_v32, %v3196_v8  ;;  %v1920_v23 = vsel %vm248_vm0, 0.0, %v1919_v34  ;;  %v2237_v32 = vsel %vm248_vm0, 0.0, %v2236_v53 }
 0x402   : > { %v2168_v35 = vsel %vm358_vm4, %v2167_v51, %v3182_v58  ;;  %v2481_v40 = vsel %vm358_vm4, %v2480_v4, %v3181_v60  ;;  %v3263_v19 = vpack.i.bf16 %v1920_v23, %v2237_v32  ;;  %v3207_v27 = vunpack.i.h.bf16 %v3205_v63 }
 0x403   : > { %v2169_v33 = vsel %vm360_vm5, %v2168_v35, %v3202_v39  ;;  %v2482_v12 = vsel %vm360_vm5, %v2481_v40, %v3201_v48  ;;  %v3192_v8 = vunpack.i.h.bf16 %v4990_v11 }
 0x404   : > { %2667 = vrot.lane.b32.xlu0 %v2653_v47, %s3386_s10  ;;  %v2483_v53 = vsel %vm362_vm6, %v2482_v12, %v3186_v3  ;;  %v2170_v34 = vsel %vm362_vm6, %v2169_v33, %v3187_v49  ;;  %v3212_v3 = vunpack.i.h.bf16 %v5059_v37 }
 0x405   : > { %v2484_v58 = vsel %vm364_vm7, %v2483_v53, %v3206_v42  ;;  %v2171_v60 = vsel %vm364_vm7, %v2170_v34, %v3207_v27 }
 0x406   : > { %v5068_v39 = vsel %vm366_vm8, %v2484_v58, %v3191_v41  ;;  %v2172_v48 = vsel %vm366_vm8, %v2171_v60, %v3192_v8 }
 0x407   : > { %3264 = vrot.lane.b32.xlu1 %v3263_v19, %s3386_s10  ;;  %v2173_v53 = vsel %vm368_vm9, %v2172_v48, %v3212_v3  ;;  %s2853_s10 = sshll.u32 %s3366_s22, 1 }
 0x408   : > { %2683 = vrot.lane.b32.xlu2 %v2657_v52, %s3389_s15 }
 0x40c   : > { %3259 = vrot.lane.b32.xlu0 %v3258_v50, %s3388_s13 }
 0x40f   : > { %3274 = vrot.lane.b32.xlu1 %v3273_v46, %s3388_s13  ;;  %s2756_s13 = sadd.s32 %s3362_s21, %s2853_s10  ;;  %s2746_s21 = scalar_lea.sflag [#allocation3], %s229_s12 }
 0x410   : > { %2053 = vrot.lane.b32.xlu2 %v2027_v29, %s3389_s15  ;;  %s2854_s16 = sshll.u32 %s2756_s13, 2 }
 0x411   : > { %s2758_s14 = scalar_lea.hbm %s5210_s5, %s2854_s16 }
 0x412   : > { %s2762_s8 = sshll.u32 %s2758_s14, 4  ;;  %s2763_s8 = int_to_ptr.hbm [resolvable:$true] %s2762_s8 }
 0x413   : > { %s3298_s22 = sshra.s32 %s2763_s8, 4  ;;  %s3299_s22 = int_to_ptr.hbm [resolvable:$true] %s3298_s22 }
 0x414   : > { %3269 = vrot.lane.b32.xlu0 %v3268_v54, %s3389_s15  ;;  %p3305_p2 = scmp.lt.s32.totalorder %s3299_s22, %s5210_s5 }
 0x417   : > { %2049 = vrot.lane.b32.xlu1 %v2019_v6, %s3385_s9  ;;  %s3300_s9 = scalar_lea.hbm %s3299_s22, 4 }
 0x418   : > { %p3301_p13 = scmp.ne.s32.totalorder %s3299_s22, %s3300_s9 }
 0x41a   : > { %p3302_p0 = pnand %p3301_p13, %p3474_p3 }
 0x41c   : > { %3279 = vrot.lane.b32.xlu0 %v3278_v36, %s3389_s15  ;;  %s2842_s15 = sshll.u32 %s229_s12, 2  ;;  %p3303_p1 = pneg %p3302_p0 }
 0x41d   : > { %s231_s27 = scalar_lea.vmem [#allocation2], %s2842_s15  ;;  %s3304_s15 = scalar_lea.hbm %s5210_s5, 16 }
 0x41e   : > { %s2760_s30 = sshll.u32 %s231_s27, 4  ;;  %p3306_p4 = scmp.lt.s32.totalorder %s3304_s15, %s3300_s9  ;;  %s2761_s30 = int_to_ptr.vmem [resolvable:$true] %s2760_s30 }
 0x420   : > { %p3307_p5 = por %p3306_p4, %p3305_p2 }
 0x422   : > { %p3308_p6 = pnand %p3307_p5, %p3303_p1 }
 0x424   : > { %2713 = vperm.xlu0 %3283, %v2710_v30  }
 0x42a   : > { %v2034_v18 = vpop.permute.xlu2 %2033 }
 0x432   : > { %v3215_v51 = vpop.permute.xlu2 %3214 }
 0x433   : > { %v3216_v54 = vunpack.i.l.bf16 %v3215_v51  ;;  %v3217_v20 = vunpack.i.h.bf16 %v3215_v51 }
 0x43a   : > { %v5071_v40 = vpop.permute.xlu2 %3219 }
 0x43b   : > { %v3222_v8 = vunpack.i.h.bf16 %v5071_v40 }
 0x442   : > { %v5075_v12 = vpop.permute.xlu2 %3224 }
 0x443   : > { %v3227_v51 = vunpack.i.h.bf16 %v5075_v12 }
 0x446   : > { %v2042_v4 = vpop.permute.xlu0 %2041 }
 0x449   : > { %v2672_v35 = vpop.permute.xlu1 %2671 }
 0x44a   : > { %v5077_v23 = vpop.permute.xlu2 %2045 }
 0x44e   : > { %v2664_v62 = vpop.permute.xlu0 %2663 }
 0x451   : > { %v5073_v11 = vpop.permute.xlu1 %3229 }
 0x452   : > { %v3250_v15 = vpop.permute.xlu2 %3249 }
 0x453   : > { %v3251_v36 = vunpack.i.l.bf16 %v3250_v15  ;;  %v3252_v41 = vunpack.i.h.bf16 %v3250_v15 }
 0x456   : > { %v2030_v33 = vpop.permute.xlu0 %2029 }
 0x457   : > { %v2056_v45 = vsel %vm356_vm3, %v4890_v21, %v2030_v33 }
 0x458   : > { %v2057_v47 = vsel %vm358_vm4, %v2056_v45, %v2034_v18 }
 0x459   : > { %v2680_v56 = vpop.permute.xlu1 %2679 }
 0x45a   : > { %v2676_v6 = vpop.permute.xlu2 %2675 }
 0x45e   : > { %v5079_v32 = vpop.permute.xlu0 %3234 }
 0x461   : > { %v5081_v24 = vpop.permute.xlu1 %3239 }
 0x462   : > { %v2684_v61 = vpop.permute.xlu2 %2683 }
 0x466   : > { %v2038_v19 = vpop.permute.xlu0 %2037 }
 0x467   : > { %v2058_v43 = vsel %vm360_vm5, %v2057_v47, %v2038_v19 }
 0x468   : > { %v2059_v55 = vsel %vm362_vm6, %v2058_v43, %v2042_v4  ;;  %v3226_v4 = vunpack.i.l.bf16 %v5075_v12 }
 0x469   : > { %v3245_v1 = vpop.permute.xlu1 %3244  ;;  %v2060_v12 = vsel %vm364_vm7, %v2059_v55, %v5077_v23 }
 0x46a   : > { %v3246_v0 = vunpack.i.l.bf16 %v3245_v1  ;;  %v3247_v29 = vunpack.i.h.bf16 %v3245_v1 }
 0x46c   : > { %v2583_v25 = vsel %vm356_vm3, %v4962_v57, %v3246_v0  ;;  %v2373_v13 = vsel %vm356_vm3, %v4956_v7, %v3247_v29  ;;  %v3211_v57 = vunpack.i.l.bf16 %v5059_v37  ;;  %v3221_v7 = vunpack.i.l.bf16 %v5071_v40 }
 0x46d   : > { %v2584_v10 = vsel %vm358_vm4, %v2583_v25, %v3216_v54  ;;  %v2374_v18 = vsel %vm358_vm4, %v2373_v13, %v3217_v20  ;;  %v3232_v40 = vunpack.i.h.bf16 %v5073_v11  ;;  %v3242_v13 = vunpack.i.h.bf16 %v5081_v24 }
 0x46e   : > { %v2660_v17 = vpop.permute.xlu0 %2659  ;;  %v2585_v42 = vsel %vm360_vm5, %v2584_v10, %v3251_v36  ;;  %v3241_v10 = vunpack.i.l.bf16 %v5081_v24  ;;  %v2709_v24 = vld [vmem:[%s5208_s3] sm:$0xf] }
 0x46f   : > { %v2686_v31 = vsel %vm356_vm3, %v4996_v16, %v2660_v17 }
 0x470   : > { %v2687_v44 = vsel %vm358_vm4, %v2686_v31, %v2664_v62  ;;  %v2586_v62 = vsel %vm362_vm6, %v2585_v42, %v3221_v7 }
 0x471   : > { %v3255_v52 = vpop.permute.xlu1 %3254 }
 0x472   : > { %v3257_v63 = vunpack.i.h.bf16 %v3255_v52  ;;  %v3256_v59 = vunpack.i.l.bf16 %v3255_v52  ;;  %v2054_v52 = vpop.permute.xlu2 %2053 }
 0x474   : > { %v1953_v34 = vsel %vm356_vm3, %v4985_v26, %v3257_v63  ;;  %v2270_v58 = vsel %vm356_vm3, %v4988_v2, %v3256_v59  ;;  %v3231_v26 = vunpack.i.l.bf16 %v5073_v11 }
 0x475   : > { %v1954_v2 = vsel %vm358_vm4, %v1953_v34, %v3227_v51  ;;  %v2271_v45 = vsel %vm358_vm4, %v2270_v58, %v3226_v4 }
 0x476   : > { %v2668_v22 = vpop.permute.xlu0 %2667 }
 0x477   : > { %v2688_v21 = vsel %vm360_vm5, %v2687_v44, %v2668_v22 }
 0x478   : > { %v2689_v5 = vsel %vm362_vm6, %v2688_v21, %v2672_v35  ;;  %v2375_v35 = vsel %vm360_vm5, %v2374_v18, %v3252_v41  ;;  %v3237_v21 = vunpack.i.h.bf16 %v5079_v32 }
 0x479   : > { %v3265_v50 = vpop.permute.xlu1 %3264  ;;  %v2690_v46 = vsel %vm364_vm7, %v2689_v5, %v2676_v6  ;;  %v2376_v43 = vsel %vm362_vm6, %v2375_v35, %v3222_v8 }
 0x47a   : > { %v2691_v16 = vsel %vm366_vm8, %v2690_v46, %v2680_v56  ;;  %v3267_v60 = vunpack.i.h.bf16 %v3265_v50  ;;  %v3266_v37 = vunpack.i.l.bf16 %v3265_v50  ;;  %v2697_v56 = vrot.slane %v2173_v53, 4 }
 0x47b   : > { %v2692_v14 = vsel %vm368_vm9, %v2691_v16, %v2684_v61  ;;  %v3236_v50 = vunpack.i.l.bf16 %v5079_v32  ;;  %v2486_v46 = vsel %vm368_vm9, %v5068_v39, %v3211_v57 }
 0x47c   : > { %2850 = vmatpush.msk.msra.mxu2 %vm1517_vm10, %v2692_v14  ;;  %v1955_v47 = vsel %vm360_vm5, %v1954_v2, %v3267_v60  ;;  %v2272_v19 = vsel %vm360_vm5, %v2271_v45, %v3266_v37 }
 0x47d   : > { %v1956_v61 = vsel %vm362_vm6, %v1955_v47, %v3237_v21  ;;  %v2273_v29 = vsel %vm362_vm6, %v2272_v19, %v3236_v50 }
 0x47e   : > { %v3260_v38 = vpop.permute.xlu0 %3259 }
 0x47f   : > { %v3261_v27 = vunpack.i.l.bf16 %v3260_v38  ;;  %v3262_v33 = vunpack.i.h.bf16 %v3260_v38 }
 0x481   : > { %v3275_v49 = vpop.permute.xlu1 %3274  ;;  %v2587_v48 = vsel %vm364_vm7, %v2586_v62, %v3261_v27  ;;  %v2377_v22 = vsel %vm364_vm7, %v2376_v43, %v3262_v33 }
 0x482   : > { %v3277_v6 = vunpack.i.h.bf16 %v3275_v49  ;;  %v3276_v31 = vunpack.i.l.bf16 %v3275_v49  ;;  %v2588_v44 = vsel %vm366_vm8, %v2587_v48, %v3231_v26  ;;  %v2378_v25 = vsel %vm366_vm8, %v2377_v22, %v3232_v40 }
 0x484   : > { %v1957_v14 = vsel %vm364_vm7, %v1956_v61, %v3277_v6  ;;  %v2274_v54 = vsel %vm364_vm7, %v2273_v29, %v3276_v31 }
 0x485   : > { %v2275_v36 = vsel %vm366_vm8, %v2274_v54, %v3241_v10  ;;  %v1958_v59 = vsel %vm366_vm8, %v1957_v14, %v3242_v13 }
 0x486   : > { %v3270_v15 = vpop.permute.xlu0 %3269 }
 0x487   : > { %v3271_v1 = vunpack.i.l.bf16 %v3270_v15  ;;  %v3272_v0 = vunpack.i.h.bf16 %v3270_v15 }
 0x489   : > { %v2050_v17 = vpop.permute.xlu1 %2049  ;;  %v2589_v23 = vsel %vm368_vm9, %v2588_v44, %v3271_v1  ;;  %v2379_v32 = vsel %vm368_vm9, %v2378_v25, %v3272_v0 }
 0x48a   : > { %v2061_v11 = vsel %vm366_vm8, %v2060_v12, %v2050_v17  ;;  %v2703_v5 = vrot.slane %v2589_v23, 4  ;;  %v2700_v63 = vrot.slane %v2379_v32, 4 }
 0x48b   : > { %v2062_v55 = vsel %vm368_vm9, %v2061_v11, %v2054_v52 }
 0x48c   : > { %v2706_v30 = vsel %vm1517_vm10, %v2062_v55, %v2697_v56  ;;  %v2708_v16 = vsel %vm1517_vm10, %v2486_v46, %v2703_v5 }
 0x48d   : > { %2734 = vmatpush.msra.mxu2 %v2708_v16 }
 0x48e   : > { %v3280_v39 = vpop.permute.xlu0 %3279 }
 0x48f   : > { %v3282_v38 = vunpack.i.h.bf16 %v3280_v39  ;;  %v3281_v20 = vunpack.i.l.bf16 %v3280_v39 }
 0x491   : > { %v2276_v49 = vsel %vm368_vm9, %v2275_v36, %v3281_v20  ;;  %v1959_v3 = vsel %vm368_vm9, %v1958_v59, %v3282_v38 }
 0x492   : > { %v2707_v57 = vsel %vm1517_vm10, %v2276_v49, %v2700_v63  ;;  %v2694_v18 = vrot.slane %v1959_v3, 4 }
 0x493   : > { %2735 = vmatpush.msra.mxu2 %v2707_v57 }
 0x494   : > { %v2705_v27 = vsel %vm1517_vm10, %v4926_v9, %v2694_v18 }
 0x495   : > { %2736 = vmatpush.msra.mxu2 %v2706_v30 }
 0x496   : > { %v2714_v42 = vpop.permute.xlu0 %2713 }
 0x497   : > { %2737 = vmatpush.msra.mxu2 %v2705_v27 }
 0x498   : > { %2851 = vmatmul.msk.f32.vlgmr.msra.gmra.mxu2 %vm1533_vm11, %v2709_v24 }
 0x51b   : > { %v2739_v8 = vpop.f32.mrf.mxu2 }
 0x51c   : > { %v2740_v7 = vadd.f32 %v2739_v8, %v2714_v42 }
 0x51e   : > { %v2742_v9 = vadd.f32 %v2740_v7, %v4335_v28 }
 0x520   : > { %v2743_v41 = vmax.f32 %v2742_v9, 0.0 }
 0x522   : > { %2744 = vst [vmem:[%s231_s27] sm:$0xf] %v2743_v41 }
 0x523   : > { %3311 = shalt.err (!%p3308_p6)
}
 0x524   : > { %2858 = dma.vmem_to_hbm [thread:$0]  (%p3474_p3), %s2761_s30, 64, %s2763_s8, %s2746_s21  }
 0x525 PF: > { %p2864_p7 = scmp.ge.s32.totalorder %s3378_s25, 2  ;;  %s2774_s12 = sand.u32 1, %s3350_s18  }
 0x526   : > { %s2775_s17 = scalar_lea.sflag [#allocation3], %s2774_s12 }
 0x527   : > { %p2861_p9 = pnand %p2864_p7, %p3483_p8 }
 0x529   : > { %p2862_p10 = pneg %p2861_p9 }
 0x52b   : > { %3345 = dma.done.wait (%p2862_p10), %s2775_s17, 64  }
 0x52c   : > { %3347 = vsyncadd (%p2862_p10), %s2775_s17, 4294967232  ;;  %s18_s25 = sadd.s32 1, %s3378_s25   ;;  %s5255_s18 = smov %s3354_s19 }
 0x52d   : > { %p15_p11 = scmp.ge.s32.totalorder %s18_s25, 6   ;;  %s5256_s19 = smov %s3358_s20 }
 0x52e   : > { %s5257_s20 = smov %s3492_s11  ;;  %s5258_s21 = smov %s3370_s23 }
 0x52f   : > { %s5259_s22 = smov %s3374_s24  ;;  %s5260_s23 = smov %s5263_s28 }
 0x530   : > { %s5261_s24 = smov %s5267_s29  ;;  %17 = sbr.rel (!%p15_p11) target bundleno = 5 (0x5), region = 76 }
 0x535   :  { %2781 = vsyncpa [#allocation3], 1 }
 0x536   :  { %2783 = vsyncpa [#allocation3 + $0x1], 1 }

</bundles_post_ra>
